<compile_context>
chip_gen: v6e
topology: v6e:2x2x1
jax: 0.10.0
libtpu: 0.0.40
codegen_flags: <defaults>
</compile_context>

<pallas_src>
import math
import numpy as np
import jax
import jax.numpy as jnp
from jax.experimental import pallas as pl
from jax.experimental.pallas import tpu as pltpu

LANES = 128  # pad every feature dimension to one full lane width


# ---------------------------------------------------------------------------
# Fused sequence kernel
# ---------------------------------------------------------------------------
def rnn_block_kernel(x_ref, h0_ref, wxh_ref, whh_ref, wo_ref, bh_ref, bo_ref,
                     out_ref, hlast_ref, h_carry, xp_scratch):
    """Grid = (batch_tiles [parallel], time_blocks [arbitrary]).

    x_ref      (TS, TB, D)  xs block for this (batch tile, time block)
    h0_ref     (TB, D)      initial hidden for this batch tile
    w*/b*      folded affine params, resident across the whole grid
    out_ref    (TS, TB, D)  per-timestep outputs (also used as H staging)
    hlast_ref  (TB, D)      final hidden, written only on the last time block
    h_carry    VMEM (TB, D)     hidden carried across time blocks
    xp_scratch VMEM (TS, TB, D) hoisted input projection for this block
    """
    s = pl.program_id(1)
    ts, tb, d = x_ref.shape

    @pl.when(s == 0)
    def _():
        h_carry[...] = h0_ref[...]

    # Phase 1 (off the serial path): Xp = X @ Wxh + bh, one big GEMM per block.
    x_blk = x_ref[...].reshape(ts * tb, d)
    xp = (jnp.dot(x_blk, wxh_ref[...], preferred_element_type=jnp.float32)
          + bh_ref[...])
    xp_scratch[...] = xp.reshape(ts, tb, d)

    # Phase 2: the irreducible recurrence — one (TB,128)x(128,128) dot + add
    # per step.  `ts` is a trace-time constant, so this unrolls fully (static
    # indices, no dynamic-slice lowering).
    whh = whh_ref[...]
    h = h_carry[...]
    for t in range(ts):
        h = xp_scratch[t] + jnp.dot(h, whh, preferred_element_type=jnp.float32)
        out_ref[t] = h            # stash h_t; overwritten by phase 3
    h_carry[...] = h

    # Phase 3 (off the serial path): Out = H @ Wo + bo, one big GEMM per block.
    h_blk = out_ref[...].reshape(ts * tb, d)
    out = (jnp.dot(h_blk, wo_ref[...], preferred_element_type=jnp.float32)
           + bo_ref[...])
    out_ref[...] = out.reshape(ts, tb, d)

    @pl.when(s == pl.num_programs(1) - 1)
    def _():
        hlast_ref[...] = h


# ---------------------------------------------------------------------------
# Host-side helpers: parameter folding, padding, tile picking
# ---------------------------------------------------------------------------
def _pad_to(a, shape):
    pads = [(0, s - d) for d, s in zip(a.shape, shape)]
    return jnp.pad(a, pads)


def _pick_tile(n, cap, step):
    """Largest divisor of n that is a multiple of `step` and <= cap."""
    best = step
    d = step
    lim = min(n, cap)
    while d <= lim:
        if n % d == 0:
            best = d
        d += step
    return best


def fold_params(feat_params, rec_params, out_params, n_att, ref_dim):
    """Fold the purely-affine layer chains into (Wxh, Whh, bh, Wo, bo).

    new_h = x @ Wxh + h @ Whh + bh ;  out = new_h @ Wo + bo
    (Only valid because the module never applies its ReLU in forward().)
    """
    # feature chain: v = x @ F + f
    F = jnp.eye(n_att, dtype=jnp.float32)
    f = jnp.zeros((1, n_att), jnp.float32)
    for (W, b) in feat_params:
        f = f @ W + b
        F = F @ W

    # recurrent chain: c = v @ A + h @ B + bc
    Wa, Wb, b0 = rec_params[0]
    A, B, bc = Wa, Wb, b0
    for (W, b) in rec_params[1:]:
        A = A @ W
        B = B @ W
        bc = bc @ W + b

    Wxh = F @ A                 # (n_att, ref_dim)
    Whh = B                     # (ref_dim, ref_dim)
    bh = f @ A + bc             # (1, ref_dim)

    # output chain: out = c @ O + ob
    O = jnp.eye(ref_dim, dtype=jnp.float32)
    ob = jnp.zeros((1, ref_dim), jnp.float32)
    for (W, b) in out_params:
        ob = ob @ W + b
        O = O @ W

    return Wxh, Whh, bh, O, ob


def rnn_sequence(xs, h0, feat_params, rec_params, out_params, n_output,
                 ref_dim, tb=None, ts=None):
    """Run the RNN over a whole sequence for a batch of independent sequences.

    xs: (S, B, n_att)   h0: (B, ref_dim)
    Returns (outs (S, B, n_output), final_hidden (B, ref_dim)).
    """
    S, B, n_att = xs.shape
    D = LANES
    assert max(n_att, ref_dim, n_output) <= D

    Wxh, Whh, bh, Wo, bo = fold_params(feat_params, rec_params, out_params,
                                       n_att, ref_dim)

    # Pad batch to a sublane multiple and every feature dim to 128 lanes.
    B_pad = -(-B // 8) * 8
    xs_p = _pad_to(xs.astype(jnp.float32), (S, B_pad, D))
    h0_p = _pad_to(h0.astype(jnp.float32), (B_pad, D))
    wxh_p = _pad_to(Wxh, (D, D))
    whh_p = _pad_to(Whh, (D, D))
    wo_p = _pad_to(Wo, (D, D))
    bh_p = _pad_to(bh, (1, D))
    bo_p = _pad_to(bo, (1, D))

    if tb is None:
        # Large batch tiles for MXU occupancy, but keep >= 2 tiles when the
        # batch allows it so v7x's two TensorCores both get work.
        cap_tb = min(256, max(8, B_pad // 2)) if B_pad >= 16 else B_pad
        tb = _pick_tile(B_pad, cap_tb, 8)
    if ts is None:
        # Cap the time block so double-buffered xs/outs + the Xp scratch stay
        # comfortably under v7x's 64 MiB VMEM at tb<=256.
        ts = _pick_tile(S, 32, 1)
    assert B_pad % tb == 0 and tb % 8 == 0
    assert S % ts == 0

    grid = (B_pad // tb, S // ts)

    grid_spec = pltpu.PrefetchScalarGridSpec(
        num_scalar_prefetch=0,
        grid=grid,
        in_specs=[
            pl.BlockSpec((ts, tb, D), lambda b, s: (s, b, 0)),   # xs block
            pl.BlockSpec((tb, D), lambda b, s: (b, 0)),          # h0
            pl.BlockSpec((D, D), lambda b, s: (0, 0)),           # Wxh (resident)
            pl.BlockSpec((D, D), lambda b, s: (0, 0)),           # Whh (resident)
            pl.BlockSpec((D, D), lambda b, s: (0, 0)),           # Wo  (resident)
            pl.BlockSpec((1, D), lambda b, s: (0, 0)),           # bh
            pl.BlockSpec((1, D), lambda b, s: (0, 0)),           # bo
        ],
        out_specs=(
            pl.BlockSpec((ts, tb, D), lambda b, s: (s, b, 0)),   # per-step outs
            pl.BlockSpec((tb, D), lambda b, s: (b, 0)),          # final hidden
        ),
        scratch_shapes=[
            pltpu.VMEM((tb, D), jnp.float32),       # hidden carry across time
            pltpu.VMEM((ts, tb, D), jnp.float32),   # hoisted input projection
        ],
    )

    outs_p, hlast_p = pl.pallas_call(
        rnn_block_kernel,
        out_shape=(
            jax.ShapeDtypeStruct((S, B_pad, D), jnp.float32),
            jax.ShapeDtypeStruct((B_pad, D), jnp.float32),
        ),
        grid_spec=grid_spec,
        compiler_params=pltpu.CompilerParams(
            dimension_semantics=("parallel", "arbitrary"),
            vmem_limit_bytes=48 * 1024 * 1024),
    )(xs_p, h0_p, wxh_p, whh_p, wo_p, bh_p, bo_p)

    return outs_p[:, :B, :n_output], hlast_p[:B, :ref_dim]


# ---------------------------------------------------------------------------
# Parameter construction (mimics nn.Linear init, weights pre-transposed)
# ---------------------------------------------------------------------------
def _init_linear(key, fan_in, fan_out):
    kw, kb = jax.random.split(key)
    bound = 1.0 / math.sqrt(fan_in)
    W = jax.random.uniform(kw, (fan_in, fan_out), jnp.float32, -bound, bound)
    b = jax.random.uniform(kb, (1, fan_out), jnp.float32, -bound, bound)
    return W, b


def build_params(key, n_att, nodes, n_output):
    ref_dim = nodes[1][-1]
    keys = jax.random.split(key, len(nodes[0]) + len(nodes[1]) + len(nodes[2]) + 1)
    ki = 0

    feat_params = []
    ins = n_att
    for n in nodes[0]:
        feat_params.append(_init_linear(keys[ki], ins, n)); ki += 1
        ins = n

    feat_dim = ins
    ins = ins + ref_dim                     # concat(feature_out, hidden)

    rec_params = []
    for li, n in enumerate(nodes[1]):
        W, b = _init_linear(keys[ki], ins, n); ki += 1
        if li == 0:
            rec_params.append((W[:feat_dim, :], W[feat_dim:, :], b))
        else:
            rec_params.append((W, b))
        ins = n

    out_params = []
    for n in nodes[2]:
        out_params.append(_init_linear(keys[ki], ins, n)); ki += 1
        ins = n
    out_params.append(_init_linear(keys[ki], ins, n_output))   # final 'O' layer

    return feat_params, rec_params, out_params, feat_dim, ref_dim


# ---------------------------------------------------------------------------
# Pure-JAX reference: unfolded layer-by-layer forward (matches PyTorch exactly)
# ---------------------------------------------------------------------------
def reference_sequence(xs, h0, feat_params, rec_params, out_params):
    S = xs.shape[0]
    h = h0
    outs = []
    for t in range(S):
        v = xs[t]
        for (W, b) in feat_params:
            v = v @ W + b
        Wa, Wb, b0 = rec_params[0]
        c = v @ Wa + h @ Wb + b0
        for (W, b) in rec_params[1:]:
            c = c @ W + b
        o = c
        for (W, b) in out_params:
            o = o @ W + b
        outs.append(o)
        h = c
    return jnp.stack(outs, 0), h


# TODO(synk): the module defines self.activeLayer = F.relu but forward() never
# applies it; the kernel intentionally mirrors that (purely affine step).

if __name__ == "__main__":
    key = jax.random.PRNGKey(0)
    kp, kx = jax.random.split(key)

    # Small shapes consistent with the module's constructor.
    n_att = 16
    nodes = ([32, 64], [48, 32], [24])      # feature / recurrent / output widths
    n_output = 8
    seq_len = 8
    batch = 16                              # 2 batch tiles of 8 (v7x megacore)

    feat_params, rec_params, out_params, feat_dim, ref_dim = build_params(
        kp, n_att, nodes, n_output)

    xs = jax.random.normal(kx, (seq_len, batch, n_att), jnp.float32)
    h0 = jnp.zeros((batch, ref_dim), jnp.float32)

    # One fused pallas_call for the whole sequence; sync once at the end.
    outs, h_last = rnn_sequence(xs, h0, feat_params, rec_params, out_params,
                                n_output, ref_dim)
    jax.block_until_ready((outs, h_last))

    outs_ref, h_last_ref = reference_sequence(xs, h0, feat_params, rec_params,
                                              out_params)

    ok = np.allclose(np.asarray(outs), np.asarray(outs_ref),
                     rtol=1e-4, atol=1e-4)
    ok = ok and np.allclose(np.asarray(h_last), np.asarray(h_last_ref),
                            rtol=1e-4, atol=1e-4)

    assert ok, "Pallas kernel output does not match JAX reference"
    assert outs.shape == (seq_len, batch, n_output)
    assert h_last.shape == (batch, ref_dim)
    print("KERNEL_OK")
</pallas_src>

<mosaic_0001>
module attributes {stable_mosaic.version = 11 : i64} {
  func.func @rnn_block_kernel(%arg0: i32, %arg1: i32, %arg2: memref<8x8x128xf32, #tpu.memory_space<vmem>>, %arg3: memref<8x128xf32, #tpu.memory_space<vmem>>, %arg4: memref<128x128xf32, #tpu.memory_space<vmem>>, %arg5: memref<128x128xf32, #tpu.memory_space<vmem>>, %arg6: memref<128x128xf32, #tpu.memory_space<vmem>>, %arg7: memref<1x128xf32, #tpu.memory_space<vmem>>, %arg8: memref<1x128xf32, #tpu.memory_space<vmem>>, %arg9: memref<8x8x128xf32, #tpu.memory_space<vmem>>, %arg10: memref<8x128xf32, #tpu.memory_space<vmem>>, %arg11: memref<8x128xf32, #tpu.memory_space<vmem>>, %arg12: memref<8x8x128xf32, #tpu.memory_space<vmem>>) attributes {dimension_semantics = [#tpu.dimension_semantics<parallel>, #tpu.dimension_semantics<arbitrary>], iteration_bounds = array<i64: 2, 1>, scalar_prefetch = 0 : i64, scratch_operands = 2 : i64, tpu.core_type = #tpu.core_type<tc>, window_params = [{transform_indices = @transform_0, window_bounds = array<i64: 8, 8, 128>}, {transform_indices = @transform_1, window_bounds = array<i64: 8, 128>}, {pipeline_mode = #tpu.pipeline_mode<synchronous>, transform_indices = @transform_2, window_bounds = array<i64: 128, 128>}, {pipeline_mode = #tpu.pipeline_mode<synchronous>, transform_indices = @transform_3, window_bounds = array<i64: 128, 128>}, {pipeline_mode = #tpu.pipeline_mode<synchronous>, transform_indices = @transform_4, window_bounds = array<i64: 128, 128>}, {pipeline_mode = #tpu.pipeline_mode<synchronous>, transform_indices = @transform_5, window_bounds = array<i64: 1, 128>}, {pipeline_mode = #tpu.pipeline_mode<synchronous>, transform_indices = @transform_6, window_bounds = array<i64: 1, 128>}, {transform_indices = @transform_7, window_bounds = array<i64: 8, 8, 128>}, {transform_indices = @transform_8, window_bounds = array<i64: 8, 128>}]} {
    %c0_i32 = arith.constant 0 : i32
    %0 = arith.cmpi eq, %arg1, %c0_i32 : i32
    %1 = arith.extui %0 : i1 to i32
    %c0_i32_0 = arith.constant 0 : i32
    %2 = arith.cmpi ne, %1, %c0_i32_0 : i32
    scf.if %2 {
      %c0_78 = arith.constant 0 : index
      %c0_79 = arith.constant 0 : index
      %83 = vector.load %arg3[%c0_78, %c0_79] : memref<8x128xf32, #tpu.memory_space<vmem>>, vector<8x128xf32>
      %c0_80 = arith.constant 0 : index
      %c0_81 = arith.constant 0 : index
      %84 = vector.load %arg11[%c0_80, %c0_81] : memref<8x128xf32, #tpu.memory_space<vmem>>, vector<8x128xf32>
      tpu.vector_store %arg11[%c0_80, %c0_81], %83 {strides = array<i32>} : memref<8x128xf32, #tpu.memory_space<vmem>>, vector<8x128xf32>,
    } else {
    }
    %c0 = arith.constant 0 : index
    %c0_1 = arith.constant 0 : index
    %c0_2 = arith.constant 0 : index
    %3 = vector.load %arg2[%c0, %c0_1, %c0_2] : memref<8x8x128xf32, #tpu.memory_space<vmem>>, vector<8x8x128xf32>
    %4 = vector.shape_cast %3 : vector<8x8x128xf32> to vector<64x128xf32>
    %c0_3 = arith.constant 0 : index
    %c0_4 = arith.constant 0 : index
    %5 = vector.load %arg4[%c0_3, %c0_4] : memref<128x128xf32, #tpu.memory_space<vmem>>, vector<128x128xf32>
    %cst = arith.constant dense<0.000000e+00> : vector<64x128xf32>
    %6 = tpu.matmul %4, %5, %cst {dimension_numbers = #tpu.dot_dimension_numbers<[1], [0], [0], [1], [0, 0, 1, 1], [], []>} : vector<64x128xf32>, vector<128x128xf32>, vector<64x128xf32> -> vector<64x128xf32>
    %c0_5 = arith.constant 0 : index
    %c0_6 = arith.constant 0 : index
    %7 = vector.load %arg7[%c0_5, %c0_6] : memref<1x128xf32, #tpu.memory_space<vmem>>, vector<1x128xf32>
    %8 = vector.broadcast %7 : vector<1x128xf32> to vector<64x128xf32>
    %9 = arith.addf %6, %8 : vector<64x128xf32>
    %10 = vector.shape_cast %9 : vector<64x128xf32> to vector<8x8x128xf32>
    %c0_7 = arith.constant 0 : index
    %c0_8 = arith.constant 0 : index
    %c0_9 = arith.constant 0 : index
    %11 = vector.load %arg12[%c0_7, %c0_8, %c0_9] : memref<8x8x128xf32, #tpu.memory_space<vmem>>, vector<8x8x128xf32>
    tpu.vector_store %arg12[%c0_7, %c0_8, %c0_9], %10 {strides = array<i32>} : memref<8x8x128xf32, #tpu.memory_space<vmem>>, vector<8x8x128xf32>,
    %c0_10 = arith.constant 0 : index
    %c0_11 = arith.constant 0 : index
    %12 = vector.load %arg5[%c0_10, %c0_11] : memref<128x128xf32, #tpu.memory_space<vmem>>, vector<128x128xf32>
    %c0_12 = arith.constant 0 : index
    %c0_13 = arith.constant 0 : index
    %13 = vector.load %arg11[%c0_12, %c0_13] : memref<8x128xf32, #tpu.memory_space<vmem>>, vector<8x128xf32>
    %c0_14 = arith.constant 0 : index
    %c0_15 = arith.constant 0 : index
    %c0_16 = arith.constant 0 : index
    %14 = vector.load %arg12[%c0_14, %c0_15, %c0_16] : memref<8x8x128xf32, #tpu.memory_space<vmem>>, vector<1x8x128xf32>
    %15 = vector.shape_cast %14 : vector<1x8x128xf32> to vector<8x128xf32>
    %cst_17 = arith.constant dense<0.000000e+00> : vector<8x128xf32>
    %16 = tpu.matmul %13, %12, %cst_17 {dimension_numbers = #tpu.dot_dimension_numbers<[1], [0], [0], [1], [0, 0, 1, 1], [], []>} : vector<8x128xf32>, vector<128x128xf32>, vector<8x128xf32> -> vector<8x128xf32>
    %17 = arith.addf %15, %16 : vector<8x128xf32>
    %c0_18 = arith.constant 0 : index
    %c0_19 = arith.constant 0 : index
    %c0_20 = arith.constant 0 : index
    %18 = vector.load %arg9[%c0_18, %c0_19, %c0_20] : memref<8x8x128xf32, #tpu.memory_space<vmem>>, vector<1x8x128xf32>
    %19 = vector.shape_cast %18 : vector<1x8x128xf32> to vector<8x128xf32>
    %20 = vector.shape_cast %17 : vector<8x128xf32> to vector<1x8x128xf32>
    tpu.vector_store %arg9[%c0_18, %c0_19, %c0_20], %20 {strides = array<i32>} : memref<8x8x128xf32, #tpu.memory_space<vmem>>, vector<1x8x128xf32>,
    %c1 = arith.constant 1 : index
    %c0_21 = arith.constant 0 : index
    %c0_22 = arith.constant 0 : index
    %21 = vector.load %arg12[%c1, %c0_21, %c0_22] : memref<8x8x128xf32, #tpu.memory_space<vmem>>, vector<1x8x128xf32>
    %22 = vector.shape_cast %21 : vector<1x8x128xf32> to vector<8x128xf32>
    %cst_23 = arith.constant dense<0.000000e+00> : vector<8x128xf32>
    %23 = tpu.matmul %17, %12, %cst_23 {dimension_numbers = #tpu.dot_dimension_numbers<[1], [0], [0], [1], [0, 0, 1, 1], [], []>} : vector<8x128xf32>, vector<128x128xf32>, vector<8x128xf32> -> vector<8x128xf32>
    %24 = arith.addf %22, %23 : vector<8x128xf32>
    %c1_24 = arith.constant 1 : index
    %c0_25 = arith.constant 0 : index
    %c0_26 = arith.constant 0 : index
    %25 = vector.load %arg9[%c1_24, %c0_25, %c0_26] : memref<8x8x128xf32, #tpu.memory_space<vmem>>, vector<1x8x128xf32>
    %26 = vector.shape_cast %25 : vector<1x8x128xf32> to vector<8x128xf32>
    %27 = vector.shape_cast %24 : vector<8x128xf32> to vector<1x8x128xf32>
    tpu.vector_store %arg9[%c1_24, %c0_25, %c0_26], %27 {strides = array<i32>} : memref<8x8x128xf32, #tpu.memory_space<vmem>>, vector<1x8x128xf32>,
    %c2 = arith.constant 2 : index
    %c0_27 = arith.constant 0 : index
    %c0_28 = arith.constant 0 : index
    %28 = vector.load %arg12[%c2, %c0_27, %c0_28] : memref<8x8x128xf32, #tpu.memory_space<vmem>>, vector<1x8x128xf32>
    %29 = vector.shape_cast %28 : vector<1x8x128xf32> to vector<8x128xf32>
    %cst_29 = arith.constant dense<0.000000e+00> : vector<8x128xf32>
    %30 = tpu.matmul %24, %12, %cst_29 {dimension_numbers = #tpu.dot_dimension_numbers<[1], [0], [0], [1], [0, 0, 1, 1], [], []>} : vector<8x128xf32>, vector<128x128xf32>, vector<8x128xf32> -> vector<8x128xf32>
    %31 = arith.addf %29, %30 : vector<8x128xf32>
    %c2_30 = arith.constant 2 : index
    %c0_31 = arith.constant 0 : index
    %c0_32 = arith.constant 0 : index
    %32 = vector.load %arg9[%c2_30, %c0_31, %c0_32] : memref<8x8x128xf32, #tpu.memory_space<vmem>>, vector<1x8x128xf32>
    %33 = vector.shape_cast %32 : vector<1x8x128xf32> to vector<8x128xf32>
    %34 = vector.shape_cast %31 : vector<8x128xf32> to vector<1x8x128xf32>
    tpu.vector_store %arg9[%c2_30, %c0_31, %c0_32], %34 {strides = array<i32>} : memref<8x8x128xf32, #tpu.memory_space<vmem>>, vector<1x8x128xf32>,
    %c3 = arith.constant 3 : index
    %c0_33 = arith.constant 0 : index
    %c0_34 = arith.constant 0 : index
    %35 = vector.load %arg12[%c3, %c0_33, %c0_34] : memref<8x8x128xf32, #tpu.memory_space<vmem>>, vector<1x8x128xf32>
    %36 = vector.shape_cast %35 : vector<1x8x128xf32> to vector<8x128xf32>
    %cst_35 = arith.constant dense<0.000000e+00> : vector<8x128xf32>
    %37 = tpu.matmul %31, %12, %cst_35 {dimension_numbers = #tpu.dot_dimension_numbers<[1], [0], [0], [1], [0, 0, 1, 1], [], []>} : vector<8x128xf32>, vector<128x128xf32>, vector<8x128xf32> -> vector<8x128xf32>
    %38 = arith.addf %36, %37 : vector<8x128xf32>
    %c3_36 = arith.constant 3 : index
    %c0_37 = arith.constant 0 : index
    %c0_38 = arith.constant 0 : index
    %39 = vector.load %arg9[%c3_36, %c0_37, %c0_38] : memref<8x8x128xf32, #tpu.memory_space<vmem>>, vector<1x8x128xf32>
    %40 = vector.shape_cast %39 : vector<1x8x128xf32> to vector<8x128xf32>
    %41 = vector.shape_cast %38 : vector<8x128xf32> to vector<1x8x128xf32>
    tpu.vector_store %arg9[%c3_36, %c0_37, %c0_38], %41 {strides = array<i32>} : memref<8x8x128xf32, #tpu.memory_space<vmem>>, vector<1x8x128xf32>,
    %c4 = arith.constant 4 : index
    %c0_39 = arith.constant 0 : index
    %c0_40 = arith.constant 0 : index
    %42 = vector.load %arg12[%c4, %c0_39, %c0_40] : memref<8x8x128xf32, #tpu.memory_space<vmem>>, vector<1x8x128xf32>
    %43 = vector.shape_cast %42 : vector<1x8x128xf32> to vector<8x128xf32>
    %cst_41 = arith.constant dense<0.000000e+00> : vector<8x128xf32>
    %44 = tpu.matmul %38, %12, %cst_41 {dimension_numbers = #tpu.dot_dimension_numbers<[1], [0], [0], [1], [0, 0, 1, 1], [], []>} : vector<8x128xf32>, vector<128x128xf32>, vector<8x128xf32> -> vector<8x128xf32>
    %45 = arith.addf %43, %44 : vector<8x128xf32>
    %c4_42 = arith.constant 4 : index
    %c0_43 = arith.constant 0 : index
    %c0_44 = arith.constant 0 : index
    %46 = vector.load %arg9[%c4_42, %c0_43, %c0_44] : memref<8x8x128xf32, #tpu.memory_space<vmem>>, vector<1x8x128xf32>
    %47 = vector.shape_cast %46 : vector<1x8x128xf32> to vector<8x128xf32>
    %48 = vector.shape_cast %45 : vector<8x128xf32> to vector<1x8x128xf32>
    tpu.vector_store %arg9[%c4_42, %c0_43, %c0_44], %48 {strides = array<i32>} : memref<8x8x128xf32, #tpu.memory_space<vmem>>, vector<1x8x128xf32>,
    %c5 = arith.constant 5 : index
    %c0_45 = arith.constant 0 : index
    %c0_46 = arith.constant 0 : index
    %49 = vector.load %arg12[%c5, %c0_45, %c0_46] : memref<8x8x128xf32, #tpu.memory_space<vmem>>, vector<1x8x128xf32>
    %50 = vector.shape_cast %49 : vector<1x8x128xf32> to vector<8x128xf32>
    %cst_47 = arith.constant dense<0.000000e+00> : vector<8x128xf32>
    %51 = tpu.matmul %45, %12, %cst_47 {dimension_numbers = #tpu.dot_dimension_numbers<[1], [0], [0], [1], [0, 0, 1, 1], [], []>} : vector<8x128xf32>, vector<128x128xf32>, vector<8x128xf32> -> vector<8x128xf32>
    %52 = arith.addf %50, %51 : vector<8x128xf32>
    %c5_48 = arith.constant 5 : index
    %c0_49 = arith.constant 0 : index
    %c0_50 = arith.constant 0 : index
    %53 = vector.load %arg9[%c5_48, %c0_49, %c0_50] : memref<8x8x128xf32, #tpu.memory_space<vmem>>, vector<1x8x128xf32>
    %54 = vector.shape_cast %53 : vector<1x8x128xf32> to vector<8x128xf32>
    %55 = vector.shape_cast %52 : vector<8x128xf32> to vector<1x8x128xf32>
    tpu.vector_store %arg9[%c5_48, %c0_49, %c0_50], %55 {strides = array<i32>} : memref<8x8x128xf32, #tpu.memory_space<vmem>>, vector<1x8x128xf32>,
    %c6 = arith.constant 6 : index
    %c0_51 = arith.constant 0 : index
    %c0_52 = arith.constant 0 : index
    %56 = vector.load %arg12[%c6, %c0_51, %c0_52] : memref<8x8x128xf32, #tpu.memory_space<vmem>>, vector<1x8x128xf32>
    %57 = vector.shape_cast %56 : vector<1x8x128xf32> to vector<8x128xf32>
    %cst_53 = arith.constant dense<0.000000e+00> : vector<8x128xf32>
    %58 = tpu.matmul %52, %12, %cst_53 {dimension_numbers = #tpu.dot_dimension_numbers<[1], [0], [0], [1], [0, 0, 1, 1], [], []>} : vector<8x128xf32>, vector<128x128xf32>, vector<8x128xf32> -> vector<8x128xf32>
    %59 = arith.addf %57, %58 : vector<8x128xf32>
    %c6_54 = arith.constant 6 : index
    %c0_55 = arith.constant 0 : index
    %c0_56 = arith.constant 0 : index
    %60 = vector.load %arg9[%c6_54, %c0_55, %c0_56] : memref<8x8x128xf32, #tpu.memory_space<vmem>>, vector<1x8x128xf32>
    %61 = vector.shape_cast %60 : vector<1x8x128xf32> to vector<8x128xf32>
    %62 = vector.shape_cast %59 : vector<8x128xf32> to vector<1x8x128xf32>
    tpu.vector_store %arg9[%c6_54, %c0_55, %c0_56], %62 {strides = array<i32>} : memref<8x8x128xf32, #tpu.memory_space<vmem>>, vector<1x8x128xf32>,
    %c7 = arith.constant 7 : index
    %c0_57 = arith.constant 0 : index
    %c0_58 = arith.constant 0 : index
    %63 = vector.load %arg12[%c7, %c0_57, %c0_58] : memref<8x8x128xf32, #tpu.memory_space<vmem>>, vector<1x8x128xf32>
    %64 = vector.shape_cast %63 : vector<1x8x128xf32> to vector<8x128xf32>
    %cst_59 = arith.constant dense<0.000000e+00> : vector<8x128xf32>
    %65 = tpu.matmul %59, %12, %cst_59 {dimension_numbers = #tpu.dot_dimension_numbers<[1], [0], [0], [1], [0, 0, 1, 1], [], []>} : vector<8x128xf32>, vector<128x128xf32>, vector<8x128xf32> -> vector<8x128xf32>
    %66 = arith.addf %64, %65 : vector<8x128xf32>
    %c7_60 = arith.constant 7 : index
    %c0_61 = arith.constant 0 : index
    %c0_62 = arith.constant 0 : index
    %67 = vector.load %arg9[%c7_60, %c0_61, %c0_62] : memref<8x8x128xf32, #tpu.memory_space<vmem>>, vector<1x8x128xf32>
    %68 = vector.shape_cast %67 : vector<1x8x128xf32> to vector<8x128xf32>
    %69 = vector.shape_cast %66 : vector<8x128xf32> to vector<1x8x128xf32>
    tpu.vector_store %arg9[%c7_60, %c0_61, %c0_62], %69 {strides = array<i32>} : memref<8x8x128xf32, #tpu.memory_space<vmem>>, vector<1x8x128xf32>,
    %c0_63 = arith.constant 0 : index
    %c0_64 = arith.constant 0 : index
    %70 = vector.load %arg11[%c0_63, %c0_64] : memref<8x128xf32, #tpu.memory_space<vmem>>, vector<8x128xf32>
    tpu.vector_store %arg11[%c0_63, %c0_64], %66 {strides = array<i32>} : memref<8x128xf32, #tpu.memory_space<vmem>>, vector<8x128xf32>,
    %c0_65 = arith.constant 0 : index
    %c0_66 = arith.constant 0 : index
    %c0_67 = arith.constant 0 : index
    %71 = vector.load %arg9[%c0_65, %c0_66, %c0_67] : memref<8x8x128xf32, #tpu.memory_space<vmem>>, vector<8x8x128xf32>
    %72 = vector.shape_cast %71 : vector<8x8x128xf32> to vector<64x128xf32>
    %c0_68 = arith.constant 0 : index
    %c0_69 = arith.constant 0 : index
    %73 = vector.load %arg6[%c0_68, %c0_69] : memref<128x128xf32, #tpu.memory_space<vmem>>, vector<128x128xf32>
    %cst_70 = arith.constant dense<0.000000e+00> : vector<64x128xf32>
    %74 = tpu.matmul %72, %73, %cst_70 {dimension_numbers = #tpu.dot_dimension_numbers<[1], [0], [0], [1], [0, 0, 1, 1], [], []>} : vector<64x128xf32>, vector<128x128xf32>, vector<64x128xf32> -> vector<64x128xf32>
    %c0_71 = arith.constant 0 : index
    %c0_72 = arith.constant 0 : index
    %75 = vector.load %arg8[%c0_71, %c0_72] : memref<1x128xf32, #tpu.memory_space<vmem>>, vector<1x128xf32>
    %76 = vector.broadcast %75 : vector<1x128xf32> to vector<64x128xf32>
    %77 = arith.addf %74, %76 : vector<64x128xf32>
    %78 = vector.shape_cast %77 : vector<64x128xf32> to vector<8x8x128xf32>
    %c0_73 = arith.constant 0 : index
    %c0_74 = arith.constant 0 : index
    %c0_75 = arith.constant 0 : index
    %79 = vector.load %arg9[%c0_73, %c0_74, %c0_75] : memref<8x8x128xf32, #tpu.memory_space<vmem>>, vector<8x8x128xf32>
    tpu.vector_store %arg9[%c0_73, %c0_74, %c0_75], %78 {strides = array<i32>} : memref<8x8x128xf32, #tpu.memory_space<vmem>>, vector<8x8x128xf32>,
    %c0_i32_76 = arith.constant 0 : i32
    %80 = arith.cmpi eq, %arg1, %c0_i32_76 : i32
    %81 = arith.extui %80 : i1 to i32
    %c0_i32_77 = arith.constant 0 : i32
    %82 = arith.cmpi ne, %81, %c0_i32_77 : i32
    scf.if %82 {
      %c0_78 = arith.constant 0 : index
      %c0_79 = arith.constant 0 : index
      %83 = vector.load %arg10[%c0_78, %c0_79] : memref<8x128xf32, #tpu.memory_space<vmem>>, vector<8x128xf32>
      tpu.vector_store %arg10[%c0_78, %c0_79], %66 {strides = array<i32>} : memref<8x128xf32, #tpu.memory_space<vmem>>, vector<8x128xf32>,
    } else {
    }
    return
  }
  func.func @transform_0(%arg0: i32, %arg1: i32) -> (i32, i32, i32) {
    %c0_i32 = arith.constant 0 : i32
    %c0_i32_0 = arith.constant 0 : i32
    return %arg1, %arg0, %c0_i32 : i32, i32, i32
  }
  func.func @transform_1(%arg0: i32, %arg1: i32) -> (i32, i32) {
    %c0_i32 = arith.constant 0 : i32
    %c0_i32_0 = arith.constant 0 : i32
    return %arg0, %c0_i32 : i32, i32
  }
  func.func @transform_2(%arg0: i32, %arg1: i32) -> (i32, i32) {
    %c0_i32 = arith.constant 0 : i32
    %c0_i32_0 = arith.constant 0 : i32
    %c0_i32_1 = arith.constant 0 : i32
    return %c0_i32, %c0_i32_0 : i32, i32
  }
  func.func @transform_3(%arg0: i32, %arg1: i32) -> (i32, i32) {
    %c0_i32 = arith.constant 0 : i32
    %c0_i32_0 = arith.constant 0 : i32
    %c0_i32_1 = arith.constant 0 : i32
    return %c0_i32, %c0_i32_0 : i32, i32
  }
  func.func @transform_4(%arg0: i32, %arg1: i32) -> (i32, i32) {
    %c0_i32 = arith.constant 0 : i32
    %c0_i32_0 = arith.constant 0 : i32
    %c0_i32_1 = arith.constant 0 : i32
    return %c0_i32, %c0_i32_0 : i32, i32
  }
  func.func @transform_5(%arg0: i32, %arg1: i32) -> (i32, i32) {
    %c0_i32 = arith.constant 0 : i32
    %c0_i32_0 = arith.constant 0 : i32
    %c0_i32_1 = arith.constant 0 : i32
    return %c0_i32, %c0_i32_0 : i32, i32
  }
  func.func @transform_6(%arg0: i32, %arg1: i32) -> (i32, i32) {
    %c0_i32 = arith.constant 0 : i32
    %c0_i32_0 = arith.constant 0 : i32
    %c0_i32_1 = arith.constant 0 : i32
    return %c0_i32, %c0_i32_0 : i32, i32
  }
  func.func @transform_7(%arg0: i32, %arg1: i32) -> (i32, i32, i32) {
    %c0_i32 = arith.constant 0 : i32
    %c0_i32_0 = arith.constant 0 : i32
    return %arg1, %arg0, %c0_i32 : i32, i32, i32
  }
  func.func @transform_8(%arg0: i32, %arg1: i32) -> (i32, i32) {
    %c0_i32 = arith.constant 0 : i32
    %c0_i32_0 = arith.constant 0 : i32
    return %arg0, %c0_i32 : i32, i32
  }
}

</mosaic_0001>

<bundles_post_ra>
// kernel: tpu_custom_call.1
= control target key start
LH: loop header
LB: loop body
LE: loop exit
PB: predicated region body
PF: predicated region fallthrough
CT: control target
= control target key end

     0   :  { %s3227_s0 = inlined_call_operand.hbm [shape: f32[8,16,128], index: 0, kind: input, shape index: {}]   ;;  %s3228_s1 = inlined_call_operand.hbm [shape: f32[16,128], index: 1, kind: input, shape index: {}]   ;;  %s3229_s2 = inlined_call_operand.hbm [shape: f32[128,128], index: 2, kind: input, shape index: {}]   ;;  %s3230_s3 = inlined_call_operand.hbm [shape: f32[128,128], index: 3, kind: input, shape index: {}]   ;;  %s3231_s4 = inlined_call_operand.hbm [shape: f32[128,128], index: 4, kind: input, shape index: {}]   ;;  %s3232_s5 = inlined_call_operand.vmem [shape: f32[1,128], index: 5, kind: input, shape index: {}]   ;;  %s3233_s6 = inlined_call_operand.vmem [shape: f32[1,128], index: 6, kind: input, shape index: {}]   ;;  %s3234_s7 = inlined_call_operand.hbm [shape: f32[8,16,128], index: 7, kind: output, shape index: {0}]   ;;  %s3235_s8 = inlined_call_operand.hbm [shape: f32[16,128], index: 8, kind: output, shape index: {1}]  }
   0x1   :  { %3249 = sst [smem:[#allocation27_spill]] %s3227_s0 }
   0x2   :  { %3250 = sst [smem:[#allocation28_spill]] %s3229_s2 }
   0x3   :  { %3251 = sst [smem:[#allocation29_spill]] %s3230_s3 }
   0x4   :  { %3252 = sst [smem:[#allocation30_spill]] %s3231_s4 }
   0x5   :  { %3253 = sst [smem:[#allocation31_spill]] %s3234_s7 }
   0x6   :  { %3254 = sst [smem:[#allocation32_spill]] %s3235_s8 }
   0x7   :  { %14 = vsyncpa [#allocation5], 0 }
   0x8   :  { %16 = vsyncpa [#allocation5 + $0x1], 0 }
   0x9   :  { %17 = vsyncpa [#allocation8], 0 }
   0xa   :  { %19 = vsyncpa [#allocation8 + $0x1], 0 }
   0xb   :  { %20 = vsyncpa [#allocation11], 0 }
   0xc   :  { %21 = vsyncpa [#allocation6], 0 }
   0xd   :  { %23 = vsyncpa [#allocation6 + $0x1], 0 }
   0xe   :  { %24 = vsyncpa [#allocation15], 0 }
   0xf   :  { %26 = vsyncpa [#allocation15 + $0x1], 0  ;;  %s2566_s27 = smov 0   ;;  %s2568_s28 = smov 0  }
  0x10   :  { %s2570_s29 = smov 0   ;;  %s2572_s30 = smov 0  }
  0x11   :  { %s2574_s9 = smov 0   ;;  %s2576_s10 = smov 0  }
  0x12 LB: > { %3255 = sst [smem:[#allocation22_spill]] %s2484_s27  ;;  %s2597_s11 = sadd.s32 4294967295, %s2504_s10   ;;  %s2504_s10 = sphi %s2576_s10, %s32_s10   ;;  %s2500_s9 = sphi %s2574_s9, %s3294_s9   ;;  %s2496_s30 = sphi %s2572_s30, %s3293_s30   ;;  %s2492_s29 = sphi %s2570_s29, %s3292_s29   ;;  %s2488_s28 = sphi %s2568_s28, %s3291_s28   ;;  %s2484_s27 = sphi %s2566_s27, %s3290_s27  }
  0x13   : > { %3256 = sst [smem:[#allocation23_spill]] %s2496_s30  ;;  %s1552_s12 = sadd.s32 4294967294, %s2504_s10  }
  0x14   : > { %p60_p0 = scmp.ne.s32.totalorder %s2492_s29, %s2488_s28  ;;  %p61_p1 = scmp.eq.s32.totalorder %s2504_s10, 0 }
  0x15   : > { %p66_p2 = scmp.ne.s32.totalorder %s2488_s28, %s2484_s27  ;;  %p3236_p3 = scmp.eq.s32.totalorder %s2597_s11, 0 }
  0x16   : > { %p223_p4 = scmp.eq.s32.totalorder %s2597_s11, 1  ;;  %p2608_p5 = por %p61_p1, %p60_p0 }
  0x17   : > { %p229_p6 = scmp.eq.s32.totalorder %s1552_s12, 1  ;;  %p2614_p7 = por %p3236_p3, %p66_p2 }
  0x18   : > { %p2618_p8 = por %p223_p4, %p60_p0  ;;  %p1553_p10 = scmp.ge.s32.totalorder %s2504_s10, 1 }
  0x19   : > { %p2622_p9 = por %p229_p6, %p66_p2  ;;  %p262_p11 = scmp.lt.s32.totalorder %s2504_s10, 3 }
  0x1a   : > { %s3259_s16 = scalar_select %p2618_p8, 1, 0 }
  0x1b   : > { %s3261_s17 = scalar_select %p2622_p9, 1, 0 }
  0x1c   : > { %3260 = sst [smem:[#allocation24_spill]] %s3259_s16  ;;  %p2628_p12 = pnand %p1553_p10, %p262_p11 }
  0x1d   : > { %3262 = sst [smem:[#allocation25_spill]] %s3261_s17  ;;  %s2506_s19 = smov [#allocation9]  }
  0x1e   : > { %s274_s20 = sshll.u32 %s2506_s19, 4  ;;  %p2157_p13 = pneg %p2628_p12  ;;  %s275_s20 = int_to_ptr.vmem [resolvable:$true] %s274_s20 }
  0x1f   : > { %p2184_p1 = scmp.lt.s32.totalorder %s2504_s10, 2  ;;  %s2507_s22 = smov [#allocation10]  }
  0x20   : > { %p2638_p4 = pnand %p2157_p13, %p3236_p3  ;;  %s287_s23 = sshll.u32 %s2507_s22, 4  ;;  %s288_s23 = int_to_ptr.vmem [resolvable:$true] %s287_s23 }
  0x21   : > { %p2644_p2 = pnand %p2184_p1, %p2608_p5  ;;  %s2259_s25 = scalar_lea.vmem %s275_s20, 2048 }
  0x22   : > { %p2250_p6 = pneg %p2638_p4  ;;  %p2260_p10 = scmp.ne.s32.totalorder %s275_s20, %s2259_s25 }
  0x23   : > { %p2267_p0 = scmp.lt.s32.totalorder %s275_s20, %s275_s20  ;;  %p2268_p3 = scmp.lt.s32.totalorder %s2259_s25, %s2259_s25 }
  0x24   : > { %p2262_p11 = pnand %p2260_p10, %p2250_p6 }
  0x25   : > { %p2269_p9 = por %p2268_p3, %p2267_p0 }
  0x26   : > { %p2263_p13 = pneg %p2262_p11 }
  0x28   : > { %p2270_p8 = pnand %p2269_p9, %p2263_p13 }
  0x2a   : > { %2273 = shalt.err (!%p2270_p8)
}
  0x2b   : > { %s3239_s26 = smov 128   ;;  %s3240_s12 = smov 8  }
  0x2c   : > { %s3266_s2 = sld [smem:[#allocation28_spill]]  ;;  %s2510_s22 = smov [#allocation12]  }
  0x2d   : > { %s300_s13 = sshll.u32 %s2510_s22, 4  ;;  %s2285_s17 = scalar_lea.vmem %s288_s23, 2048  ;;  %s301_s13 = int_to_ptr.vmem [resolvable:$true] %s300_s13 }
  0x2e   : > { %p2286_p5 = scmp.ne.s32.totalorder %s288_s23, %s2285_s17  ;;  %p2293_p9 = scmp.lt.s32.totalorder %s288_s23, %s288_s23 }
  0x2f   : > { %p2294_p0 = scmp.lt.s32.totalorder %s2285_s17, %s2285_s17 }
  0x30   : > { %p2288_p3 = pnand %p2286_p5, %p2250_p6 }
  0x31   : > { %p2295_p1 = por %p2294_p0, %p2293_p9 }
  0x32   : > { %2160 = dma.hbm_to_vmem [thread:$0]  (!%p2638_p4), %s3266_s2, 2048, %s275_s20, [#allocation8], %s3239_s26, %s3239_s26, %s3240_s12  }
  0x33   : > { %p2289_p8 = pneg %p2288_p3 }
  0x35   : > { %p2296_p10 = pnand %p2295_p1, %p2289_p8 }
  0x37   : > { %2299 = shalt.err (!%p2296_p10)
}
  0x38   : > { %s3267_s3 = sld [smem:[#allocation29_spill]]  ;;  %s2311_s14 = scalar_lea.vmem %s301_s13, 2048 }
  0x39   : > { %p2312_p11 = scmp.ne.s32.totalorder %s301_s13, %s2311_s14  ;;  %p2319_p3 = scmp.lt.s32.totalorder %s301_s13, %s301_s13 }
  0x3a   : > { %p2320_p8 = scmp.lt.s32.totalorder %s2311_s14, %s2311_s14 }
  0x3b   : > { %p2314_p13 = pnand %p2312_p11, %p2250_p6 }
  0x3c   : > { %p2321_p9 = por %p2320_p8, %p2319_p3 }
  0x3d   : > { %p2315_p5 = pneg %p2314_p13 }
  0x3e   : > { %2163 = dma.hbm_to_vmem [thread:$0]  (!%p2638_p4), %s3267_s3, 2048, %s288_s23, [#allocation11], %s3239_s26, %s3239_s26, %s3240_s12  }
  0x3f   : > { %p2322_p0 = pnand %p2321_p9, %p2315_p5 }
  0x41   : > { %2325 = shalt.err (!%p2322_p0)
}
  0x42   : > { %s3268_s4 = sld [smem:[#allocation30_spill]]  ;;  %s2684_s23 = sand.u32 1, %s2492_s29  }
  0x43   : > { %s44_s22 = sadd.s32 1, %s2500_s9  ;;  %s1558_s21 = sshll.u32 %s2684_s23, 6 }
  0x44   : > { %p46_p6 = scmp.ge.s32.totalorder %s44_s22, 2  ;;  %s3241_s25 = sshll.u32 %s2500_s9, 7 }
  0x45   : > { %s3270_s0 = sld [smem:[#allocation27_spill]]  ;;  %s324_s19 = scalar_lea.vmem [#allocation4], %s1558_s21 }
  0x46   : > { %s3296_s22 = smov (%p46_p6, %s44_s22), 0  ;;  %s333_s2 = sshll.u32 %s324_s19, 4  ;;  %s334_s2 = int_to_ptr.vmem [resolvable:$true] %s333_s2 }
  0x47   : > { %3269 = sst [smem:[#allocation26_spill]] %s3296_s22  ;;  %p2328_p1 = pneg %p2644_p2 }
  0x48   : > { %2166 = dma.hbm_to_vmem [thread:$0]  (!%p2638_p4), %s3268_s4, 2048, %s301_s13, [#allocation11], %s3239_s26, %s3239_s26, %s3240_s12  }
  0x49   : > { %s49_s13 = ssub.s32 %s2500_s9, %s3296_s22  ;;  %s321_s12 = scalar_lea.sflag [#allocation5], %s2684_s23 }
  0x4a   : > { %p2698_p4 = scmp.eq.s32.totalorder %s49_s13, 0  ;;  %s2339_s3 = scalar_lea.vmem %s334_s2, 1024 }
  0x4b   : > { %s332_s17 = scalar_lea.hbm %s3270_s0, %s3241_s25  ;;  %p2340_p10 = scmp.ne.s32.totalorder %s334_s2, %s2339_s3 }
  0x4c   : > { %s2511_s20 = smov [#allocation4]  }
  0x4d   : > { %p2342_p11 = pnand %p2340_p10, %p2328_p1  ;;  %s2344_s14 = sshll.u32 %s2511_s20, 4  ;;  %s2345_s14 = int_to_ptr.vmem [resolvable:$false] %s2344_s14 }
  0x4e   : > { %s2346_s21 = scalar_lea.vmem %s2345_s14, 2048  ;;  %p2347_p5 = scmp.lt.s32.totalorder %s334_s2, %s2345_s14 }
  0x4f   : > { %p2343_p13 = pneg %p2342_p11  ;;  %p2348_p3 = scmp.lt.s32.totalorder %s2346_s21, %s2339_s3 }
  0x51   : > { %p2349_p8 = por %p2348_p3, %p2347_p5 }
  0x53   : > { %p2350_p9 = pnand %p2349_p8, %p2343_p13 }
  0x55   : > { %2353 = shalt.err (!%p2350_p9)
}
  0x56   : > { %s2512_s19 = smov 256   ;;  %s3272_s13 = smov 8  }
  0x57   : > { %s3273_s25 = smov 128   ;;  %s3274_s20 = sadd.s32 1, %s2492_s29 }
  0x58   : > { %2170 = dma.hbm_to_vmem [thread:$0]  (!%p2644_p2), %s332_s17, 1024, %s334_s2, %s321_s12, %s2512_s19, %s3273_s25, %s3272_s13  }
  0x59   : > { %s2717_s14 = scalar_select %p2698_p4, %s2492_s29, %s3274_s20  }
  0x5a   : > { %s343_s3 = sand.u32 1, %s2504_s10   ;;  %s1560_s21 = sshll.u32 %s2684_s23, 3 }
  0x5b   : > { %s3275_s0 = sshll.u32 %s2500_s9, 7  ;;  %s347_s7 = scalar_lea.vmem [#allocation7], %s1560_s21 }
  0x5c   : > { %s352_s27 = scalar_lea.hbm %s3228_s1, %s3275_s0  ;;  %s354_s8 = sshll.u32 %s347_s7, 4  ;;  %s355_s8 = int_to_ptr.vmem [resolvable:$true] %s354_s8 }
  0x5d   : > { %s344_s16 = scalar_lea.sflag [#allocation8], %s343_s3  ;;  %s2367_s30 = scalar_lea.vmem %s355_s8, 128 }
  0x5e   : > { %p2368_p0 = scmp.ne.s32.totalorder %s355_s8, %s2367_s30  ;;  %s2513_s2 = smov [#allocation7]  }
  0x5f   : > { %s2372_s26 = sshll.u32 %s2513_s2, 4  ;;  %s2373_s26 = int_to_ptr.vmem [resolvable:$false] %s2372_s26 }
  0x60   : > { %p2370_p6 = pnand %p2368_p0, %p2328_p1  ;;  %s2374_s12 = scalar_lea.vmem %s2373_s26, 256 }
  0x61   : > { %p2375_p4 = scmp.lt.s32.totalorder %s355_s8, %s2373_s26  ;;  %p2376_p11 = scmp.lt.s32.totalorder %s2374_s12, %s2367_s30 }
  0x62   : > { %p2371_p10 = pneg %p2370_p6 }
  0x63   : > { %p2377_p13 = por %p2376_p11, %p2375_p4 }
  0x65   : > { %p2378_p5 = pnand %p2377_p13, %p2371_p10 }
  0x67   : > { %2381 = shalt.err (!%p2378_p5)
}
  0x68   : > { %2173 = dma.hbm_to_vmem [thread:$0]  (!%p2644_p2), %s352_s27, 128, %s355_s8, %s344_s16  }
  0x69   : > { %363 = sbr.rel (%p2628_p12) target bundleno = 1931 (0x78b), region = 48  ;;  %s2734_s0 = sand.u32 (!%p2628_p12), 1, %s2488_s28  }
  0x6a   : > { %s1563_s4 = sshll.u32 (!%p2628_p12), %s2734_s0, 6  ;;  %s366_s7 = scalar_lea.sflag (!%p2628_p12), [#allocation5], %s2734_s0 }
  0x6b   : > { %s2740_s30 = scalar_lea.vmem (!%p2628_p12), [#allocation4], %s1563_s4 }
  0x6e   : > { %2459 = dma.done.wait (%p2614_p7), %s366_s7, 1024  }
  0x6f   : > { %2461 = vsyncadd (%p2614_p7), %s366_s7, 4294966272  ;;  %s374_s8 = sand.u32 1, %s2597_s11   ;;  %s1564_s27 = sshll.u32 %s2734_s0, 3 }
  0x70   : > { %s375_s16 = scalar_lea.sflag [#allocation8], %s374_s8  ;;  %s2750_s18 = scalar_lea.vmem [#allocation7], %s1564_s27 }
  0x71   : > { %2463 = dma.done.wait (%p2614_p7), %s375_s16, 128  }
  0x72   : > { %2465 = vsyncadd (%p2614_p7), %s375_s16, 4294967168  ;;  %p3276_p12 = scmp.eq.s32.totalorder %s2597_s11, 0 }
  0x74   : > { %2467 = dma.done.wait (%p3276_p12), [#allocation8], 2048   ;;  %p3277_p2 = pmov %p3276_p12 }
  0x76   : > { %2469 = vsyncadd (%p3277_p2), [#allocation8], 4294965248  ;;  %p3278_p1 = pmov %p3277_p2 }
  0x78   : > { %2471 = dma.done.wait (%p3278_p1), [#allocation11], 4096   ;;  %p3279_p3 = pmov %p3278_p1 }
  0x79   : > { %v2514_v0 = vmov 0.0   ;;  %vm2515_vm0 = vmmov 0   ;;  %v464_v1 = vld [vmem:[#allocation9 + $0x78] sm:$0xff]  ;;  %v463_v2 = vld [vmem:[#allocation9 + $0x70] sm:$0xff]  ;;  %v462_v5 = vld [vmem:[#allocation9 + $0x68] sm:$0xff]  ;;  %s3131_s22 = scalar_lea.vmem [#allocation13], %s1563_s4 }
  0x7a   : > { %2473 = vsyncadd (%p3279_p3), [#allocation11], 4294963200  ;;  %1813 = vmatprep.subr.mxu1 %v2514_v0  ;;  %1845 = vmatprep.mubr.msk.f32.mxu1 %vm2515_vm0, %v2514_v0  ;;  %v2767_v3 = vld [vmem:[#allocation10 + $0x78] sm:$0xff]  ;;  %v2770_v4 = vld [vmem:[#allocation10 + $0x70] sm:$0xff]  ;;  %s3280_s25 = sld [smem:[#allocation23_spill]]  ;;  %s432_s19 = scalar_lea.vmem [#allocation14], %s1564_s27 }
  0x7b   : > { %1769 = vmatprep.subr.mxu0 %v464_v1  ;;  %1814 = vmatpush3.msra.mxu1 %v2767_v3  ;;  %v2773_v6 = vld [vmem:[#allocation10 + $0x68] sm:$0xff]  ;;  %v461_v7 = vld [vmem:[#allocation9 + $0x60] sm:$0xff]  ;;  %v460_v9 = vld [vmem:[#allocation9 + $0x58] sm:$0xff]  ;;  %s3281_s17 = sld [smem:[#allocation24_spill]]  ;;  %s1386_s26 = sshll.u32 %s432_s19, 4  ;;  %s1387_s26 = int_to_ptr.vmem [resolvable:$true] %s1386_s26 }
  0x7c   : > { %1770 = vmatpush3.msra.mxu0 %v464_v1  ;;  %1815 = vmatprep.subr.mxu1 %v2514_v0  ;;  %v2777_v8 = vld [vmem:[#allocation10 + $0x60] sm:$0xff]  ;;  %v2781_v10 = vld [vmem:[#allocation10 + $0x58] sm:$0xff]  ;;  %v459_v11 = vld [vmem:[#allocation9 + $0x50] sm:$0xff]  ;;  %s3282_s21 = sld [smem:[#allocation32_spill]]  ;;  %s1355_s12 = scalar_lea.sflag [#allocation15], %s2734_s0 }
  0x7d   : > { %1771 = vmatprep.subr.mxu0 %v463_v2  ;;  %1816 = vmatpush3.msra.mxu1 %v2770_v4  ;;  %v2785_v12 = vld [vmem:[#allocation10 + $0x50] sm:$0xff]  ;;  %v458_v13 = vld [vmem:[#allocation9 + $0x48] sm:$0xff]  ;;  %v457_v15 = vld [vmem:[#allocation9 + $0x40] sm:$0xff]  ;;  %s2382_s4 = scalar_lea.vmem %s1387_s26, 128  ;;  %s2516_s7 = smov [#allocation14]  }
  0x7e   : > { %1772 = vmatpush3.msra.mxu0 %v463_v2  ;;  %1817 = vmatprep.subr.mxu1 %v2514_v0  ;;  %v2789_v14 = vld [vmem:[#allocation10 + $0x48] sm:$0xff]  ;;  %v2793_v16 = vld [vmem:[#allocation10 + $0x40] sm:$0xff]  ;;  %v456_v17 = vld [vmem:[#allocation9 + $0x38] sm:$0xff]  ;;  %p2383_p7 = scmp.ne.s32.totalorder %s1387_s26, %s2382_s4 }
  0x7f   : > { %1773 = vmatprep.subr.mxu0 %v462_v5  ;;  %1818 = vmatpush3.msra.mxu1 %v2773_v6  ;;  %v2797_v18 = vld [vmem:[#allocation10 + $0x38] sm:$0xff]  ;;  %v455_v19 = vld [vmem:[#allocation9 + $0x30] sm:$0xff]  ;;  %v454_v21 = vld [vmem:[#allocation9 + $0x28] sm:$0xff] }
  0x80   : > { %1774 = vmatpush3.msra.mxu0 %v462_v5  ;;  %1819 = vmatprep.subr.mxu1 %v2514_v0  ;;  %v2801_v20 = vld [vmem:[#allocation10 + $0x30] sm:$0xff]  ;;  %v2805_v22 = vld [vmem:[#allocation10 + $0x28] sm:$0xff]  ;;  %v453_v23 = vld [vmem:[#allocation9 + $0x20] sm:$0xff]  ;;  %s1581_s13 = sshll.u32 %s3280_s25, 7 }
  0x81   : > { %1775 = vmatprep.subr.mxu0 %v461_v7  ;;  %1820 = vmatpush3.msra.mxu1 %v2777_v8  ;;  %v2809_v24 = vld [vmem:[#allocation10 + $0x20] sm:$0xff]  ;;  %v452_v25 = vld [vmem:[#allocation9 + $0x18] sm:$0xff]  ;;  %v451_v27 = vld [vmem:[#allocation9 + $0x10] sm:$0xff]  ;;  %p3283_p8 = scmp.ne.s32.totalorder %s3281_s17, 0 }
  0x82   : > { %1776 = vmatpush3.msra.mxu0 %v461_v7  ;;  %1821 = vmatprep.subr.mxu1 %v2514_v0  ;;  %v2813_v26 = vld [vmem:[#allocation10 + $0x18] sm:$0xff]  ;;  %v2817_v28 = vld [vmem:[#allocation10 + $0x10] sm:$0xff]  ;;  %v450_v29 = vld [vmem:[#allocation9 + $0x8] sm:$0xff]  ;;  %s1384_s2 = scalar_lea.hbm %s3282_s21, %s1581_s13 }
  0x83   : > { %1777 = vmatprep.subr.mxu0 %v460_v9  ;;  %1822 = vmatpush3.msra.mxu1 %v2781_v10  ;;  %v441_v30 = vld [vmem:[%s2740_s30] sm:$0xff]  ;;  %v2823_v31 = vld [vmem:[#allocation10 + $0x8] sm:$0xff]  ;;  %v449_v32 = vld [vmem:[#allocation9] sm:$0xff]  ;;  %p2384_p9 = pnand %p2383_p7, %p3283_p8 }
  0x84   : > { %1778 = vmatpush3.msra.mxu0 %v460_v9  ;;  %1823 = vmatprep.subr.mxu1 %v2514_v0  ;;  %v2826_v33 = vld [vmem:[#allocation10] sm:$0xff]  ;;  %v442_v34 = vld [vmem:[%s2740_s30 + $0x8] sm:$0xff]  ;;  %v444_v37 = vld [vmem:[%s2740_s30 + $0x18] sm:$0xff] }
  0x85   : > { %1779 = vmatprep.subr.mxu0 %v459_v11  ;;  %1824 = vmatpush3.msra.mxu1 %v2785_v12  ;;  %v439_v35 = vld [vmem:[%s2750_s18] sm:$0xff]  ;;  %v443_v36 = vld [vmem:[%s2740_s30 + $0x10] sm:$0xff]  ;;  %v448_v41 = vld [vmem:[%s2740_s30 + $0x38] sm:$0xff]  ;;  %p2385_p0 = pneg %p2384_p9 }
  0x86   : > { %1780 = vmatpush3.msra.mxu0 %v459_v11  ;;  %1825 = vmatprep.subr.mxu1 %v2514_v0  ;;  %v445_v38 = vld [vmem:[%s2740_s30 + $0x20] sm:$0xff]  ;;  %v446_v39 = vld [vmem:[%s2740_s30 + $0x28] sm:$0xff]  ;;  %v447_v40 = vld [vmem:[%s2740_s30 + $0x30] sm:$0xff]  ;;  %s2386_s30 = sshll.u32 %s2516_s7, 4  ;;  %s2387_s30 = int_to_ptr.vmem [resolvable:$false] %s2386_s30 }
  0x87   : > { %1781 = vmatprep.subr.mxu0 %v458_v13  ;;  %1826 = vmatpush3.msra.mxu1 %v2789_v14  ;;  %v2912_v44 = vld [vmem:[%s3232_s5] ss:$0 sm:$0xff]  ;;  %s2388_s8 = scalar_lea.vmem %s2387_s30, 256  ;;  %p2389_p6 = scmp.lt.s32.totalorder %s1387_s26, %s2387_s30 }
  0x88   : > { %1782 = vmatpush3.msra.mxu0 %v458_v13  ;;  %1827 = vmatprep.subr.mxu1 %v2514_v0  ;;  %p2390_p10 = scmp.lt.s32.totalorder %s2388_s8, %s2382_s4 }
  0x89   : > { %1783 = vmatprep.subr.mxu0 %v457_v15  ;;  %1828 = vmatpush3.msra.mxu1 %v2793_v16 }
  0x8a   : > { %1784 = vmatpush3.msra.mxu0 %v457_v15  ;;  %1829 = vmatprep.subr.mxu1 %v2514_v0  ;;  %v1221_v15 = vld [vmem:[#allocation12 + $0x60] sm:$0xff]  ;;  %p2391_p4 = por %p2390_p10, %p2389_p6 }
  0x8b   : > { %1785 = vmatprep.subr.mxu0 %v456_v17  ;;  %1830 = vmatpush3.msra.mxu1 %v2797_v18 }
  0x8c   : > { %1786 = vmatpush3.msra.mxu0 %v456_v17  ;;  %1831 = vmatprep.subr.mxu1 %v2514_v0  ;;  %v1218_v17 = vld [vmem:[#allocation12 + $0x48] sm:$0xff]  ;;  %p2392_p11 = pnand %p2391_p4, %p2385_p0 }
  0x8d   : > { %1787 = vmatprep.subr.mxu0 %v455_v19  ;;  %1832 = vmatpush3.msra.mxu1 %v2801_v20 }
  0x8e   : > { %1788 = vmatpush3.msra.mxu0 %v455_v19  ;;  %1833 = vmatprep.subr.mxu1 %v2514_v0  ;;  %v1216_v19 = vld [vmem:[#allocation12 + $0x38] sm:$0xff] }
  0x8f   : > { %1789 = vmatprep.subr.mxu0 %v454_v21  ;;  %1834 = vmatpush3.msra.mxu1 %v2805_v22 }
  0x90   : > { %1790 = vmatpush3.msra.mxu0 %v454_v21  ;;  %1835 = vmatprep.subr.mxu1 %v2514_v0  ;;  %v1214_v21 = vld [vmem:[#allocation12 + $0x28] sm:$0xff] }
  0x91   : > { %1791 = vmatprep.subr.mxu0 %v453_v23  ;;  %1836 = vmatpush3.msra.mxu1 %v2809_v24 }
  0x92   : > { %1792 = vmatpush3.msra.mxu0 %v453_v23  ;;  %1837 = vmatprep.subr.mxu1 %v2514_v0  ;;  %v1212_v23 = vld [vmem:[#allocation12 + $0x18] sm:$0xff] }
  0x93   : > { %1793 = vmatprep.subr.mxu0 %v452_v25  ;;  %1838 = vmatpush3.msra.mxu1 %v2813_v26 }
  0x94   : > { %1794 = vmatpush3.msra.mxu0 %v452_v25  ;;  %1839 = vmatprep.subr.mxu1 %v2514_v0  ;;  %v1210_v25 = vld [vmem:[#allocation12 + $0x8] sm:$0xff] }
  0x95   : > { %1795 = vmatprep.subr.mxu0 %v451_v27  ;;  %1840 = vmatpush3.msra.mxu1 %v2817_v28 }
  0x96   : > { %1796 = vmatpush3.msra.mxu0 %v451_v27  ;;  %1841 = vmatprep.subr.mxu1 %v2514_v0 }
  0x97   : > { %1797 = vmatprep.subr.mxu0 %v450_v29  ;;  %1801 = vmatprep.mubr.f32.mxu0 %v441_v30 }
  0x98   : > { %1798 = vmatpush3.msra.mxu0 %v450_v29  ;;  %1842 = vmatpush3.msra.mxu1 %v2823_v31 }
  0x99   : > { %1799 = vmatprep.subr.mxu0 %v449_v32  ;;  %1843 = vmatprep.subr.mxu1 %v2514_v0 }
  0x9a   : > { %1800 = vmatpush3.msra.mxu0 %v449_v32  ;;  %1844 = vmatpush3.msra.mxu1 %v2826_v33 }
  0x9b   : > { %1802 = vmatmul.mubr.f32.vlgmr.msra.gmra.mxu0 %v442_v34  ;;  %1846 = vmatmul.mubr.f32.vlgmr.msra.gmra.mxu1 %v439_v35 }
  0x9c   : > { %1848 = vmatprep.subr.mxu0 %v2514_v0  ;;  %1804 = vmatprep.mubr.f32.mxu0 %v443_v36 }
  0x9d   : > { %1849 = vmatpush3.msra.mxu0 %v2767_v3  ;;  %1883 = vmatprep.subr.mxu1 %v2514_v0 }
  0x9e   : > { %1850 = vmatprep.subr.mxu0 %v2514_v0  ;;  %1884 = vmatpush3.msra.mxu1 %v2767_v3 }
  0x9f   : > { %1851 = vmatpush3.msra.mxu0 %v2770_v4  ;;  %1885 = vmatprep.subr.mxu1 %v2514_v0 }
  0xa0   : > { %1852 = vmatprep.subr.mxu0 %v2514_v0  ;;  %1805 = vmatmul.mubr.f32.gmra.mxu0 %v444_v37 }
  0xa1   : > { %1853 = vmatpush3.msra.mxu0 %v2773_v6  ;;  %1807 = vmatprep.mubr.f32.mxu0 %v445_v38 }
  0xa2   : > { %1854 = vmatprep.subr.mxu0 %v2514_v0  ;;  %1886 = vmatpush3.msra.mxu1 %v2770_v4 }
  0xa3   : > { %1855 = vmatpush3.msra.mxu0 %v2777_v8  ;;  %1887 = vmatprep.subr.mxu1 %v2514_v0 }
  0xa4   : > { %1856 = vmatprep.subr.mxu0 %v2514_v0  ;;  %1808 = vmatmul.mubr.f32.gmra.mxu0 %v446_v39 }
  0xa5   : > { %1857 = vmatpush3.msra.mxu0 %v2781_v10  ;;  %1888 = vmatpush3.msra.mxu1 %v2773_v6 }
  0xa6   : > { %1858 = vmatprep.subr.mxu0 %v2514_v0  ;;  %1889 = vmatprep.subr.mxu1 %v2514_v0 }
  0xa7   : > { %1859 = vmatpush3.msra.mxu0 %v2785_v12  ;;  %1890 = vmatpush3.msra.mxu1 %v2777_v8 }
  0xa8   : > { %1860 = vmatprep.subr.mxu0 %v2514_v0  ;;  %1891 = vmatprep.subr.mxu1 %v2514_v0 }
  0xa9   : > { %1861 = vmatpush3.msra.mxu0 %v2789_v14  ;;  %1892 = vmatpush3.msra.mxu1 %v2781_v10 }
  0xaa   : > { %1862 = vmatprep.subr.mxu0 %v2514_v0  ;;  %1893 = vmatprep.subr.mxu1 %v2514_v0 }
  0xab   : > { %1863 = vmatpush3.msra.mxu0 %v2793_v16  ;;  %1894 = vmatpush3.msra.mxu1 %v2785_v12 }
  0xac   : > { %1864 = vmatprep.subr.mxu0 %v2514_v0  ;;  %1895 = vmatprep.subr.mxu1 %v2514_v0 }
  0xad   : > { %1865 = vmatpush3.msra.mxu0 %v2797_v18  ;;  %1896 = vmatpush3.msra.mxu1 %v2789_v14 }
  0xae   : > { %1866 = vmatprep.subr.mxu0 %v2514_v0  ;;  %1897 = vmatprep.subr.mxu1 %v2514_v0 }
  0xaf   : > { %1867 = vmatpush3.msra.mxu0 %v2801_v20  ;;  %1898 = vmatpush3.msra.mxu1 %v2793_v16 }
  0xb0   : > { %1868 = vmatprep.subr.mxu0 %v2514_v0  ;;  %1899 = vmatprep.subr.mxu1 %v2514_v0 }
  0xb1   : > { %1869 = vmatpush3.msra.mxu0 %v2805_v22  ;;  %1900 = vmatpush3.msra.mxu1 %v2797_v18 }
  0xb2   : > { %1870 = vmatprep.subr.mxu0 %v2514_v0  ;;  %1901 = vmatprep.subr.mxu1 %v2514_v0 }
  0xb3   : > { %1871 = vmatpush3.msra.mxu0 %v2809_v24  ;;  %1902 = vmatpush3.msra.mxu1 %v2801_v20 }
  0xb4   : > { %1872 = vmatprep.subr.mxu0 %v2514_v0  ;;  %1903 = vmatprep.subr.mxu1 %v2514_v0 }
  0xb5   : > { %1873 = vmatpush3.msra.mxu0 %v2813_v26  ;;  %1904 = vmatpush3.msra.mxu1 %v2805_v22 }
  0xb6   : > { %1874 = vmatprep.subr.mxu0 %v2514_v0  ;;  %1905 = vmatprep.subr.mxu1 %v2514_v0 }
  0xb7   : > { %1875 = vmatpush3.msra.mxu0 %v2817_v28  ;;  %1906 = vmatpush3.msra.mxu1 %v2809_v24 }
  0xb8   : > { %1876 = vmatprep.subr.mxu0 %v2514_v0  ;;  %1907 = vmatprep.subr.mxu1 %v2514_v0 }
  0xb9   : > { %1877 = vmatpush3.msra.mxu0 %v2823_v31  ;;  %1908 = vmatpush3.msra.mxu1 %v2813_v26 }
  0xba   : > { %1878 = vmatprep.subr.mxu0 %v2514_v0  ;;  %1909 = vmatprep.subr.mxu1 %v2514_v0 }
  0xbb   : > { %1879 = vmatpush3.msra.mxu0 %v2826_v33  ;;  %1910 = vmatpush3.msra.mxu1 %v2817_v28 }
  0xbc   : > { %1911 = vmatprep.subr.mxu1 %v2514_v0  ;;  %1915 = vmatprep.mubr.msk.f32.mxu1 %vm2515_vm0, %v2514_v0 }
  0xbd   : > { %1912 = vmatpush3.msra.mxu1 %v2823_v31  ;;  %1918 = vmatprep.subr.mxu0 %v2514_v0 }
  0xbe   : > { %1913 = vmatprep.subr.mxu1 %v2514_v0  ;;  %1810 = vmatprep.mubr.f32.mxu0 %v447_v40 }
  0xbf   : > { %1914 = vmatpush3.msra.mxu1 %v2826_v33  ;;  %1811 = vmatmul.mubr.f32.gmra.mxu0 %v448_v41 }
  0xc0   : > { %1953 = vmatprep.subr.mxu1 %v2514_v0  ;;  %1880 = vmatprep.mubr.msk.f32.mxu0 %vm2515_vm0, %v2514_v0 }
 0x15b   : > { %v1803_v42 = vpop.f32.mrf.mxu0  ;;  %v669_v43 = vpop.f32.mrf.mxu1 }
 0x15c   : > { %v544_v55 = vadd.f32 %v1803_v42, %v2912_v44 }
 0x15d   : > { %v538_v45 = vpop.f32.mrf.mxu0  ;;  %v1847_v46 = vpop.f32.mrf.mxu1 }
 0x15e   : > { %v539_v47 = vadd.f32 %v2912_v44, %v538_v45 }
 0x160   : > { %v2915_v48 = vadd.f32 %v669_v43, %v539_v47  ;;  %v2952_v49 = vpop.f32.mrf.mxu0 }
 0x161   : > { %v554_v63 = vadd.f32 %v2952_v49, %v2912_v44 }
 0x162   : > { %1881 = vmatmul.mubr.f32.vlgmr.msra.gmra.mxu0 %v2915_v48  ;;  %v548_v50 = vpop.f32.mrf.mxu0 }
 0x163   : > { %1919 = vmatpush3.msra.mxu0 %v2767_v3  ;;  %1950 = vmatprep.mubr.msk.f32.mxu0 %vm2515_vm0, %v2514_v0  ;;  %v549_v59 = vadd.f32 %v2912_v44, %v548_v50 }
 0x164   : > { %1920 = vmatprep.subr.mxu0 %v2514_v0  ;;  %v2954_v51 = vpop.f32.mrf.mxu0 }
 0x165   : > { %1921 = vmatpush3.msra.mxu0 %v2770_v4 }
 0x166   : > { %1922 = vmatprep.subr.mxu0 %v2514_v0  ;;  %v2956_v52 = vpop.f32.mrf.mxu0 }
 0x167   : > { %1923 = vmatpush3.msra.mxu0 %v2773_v6  ;;  %v559_v7 = vadd.f32 %v2912_v44, %v2956_v52 }
 0x168   : > { %1924 = vmatprep.subr.mxu0 %v2514_v0 }
 0x169   : > { %1925 = vmatpush3.msra.mxu0 %v2777_v8 }
 0x16a   : > { %1926 = vmatprep.subr.mxu0 %v2514_v0 }
 0x16b   : > { %1927 = vmatpush3.msra.mxu0 %v2781_v10 }
 0x16c   : > { %1928 = vmatprep.subr.mxu0 %v2514_v0 }
 0x16d   : > { %1929 = vmatpush3.msra.mxu0 %v2785_v12 }
 0x16e   : > { %1930 = vmatprep.subr.mxu0 %v2514_v0 }
 0x16f   : > { %1931 = vmatpush3.msra.mxu0 %v2789_v14 }
 0x170   : > { %1932 = vmatprep.subr.mxu0 %v2514_v0 }
 0x171   : > { %1933 = vmatpush3.msra.mxu0 %v2793_v16 }
 0x172   : > { %1934 = vmatprep.subr.mxu0 %v2514_v0 }
 0x173   : > { %1935 = vmatpush3.msra.mxu0 %v2797_v18 }
 0x174   : > { %1936 = vmatprep.subr.mxu0 %v2514_v0 }
 0x175   : > { %1937 = vmatpush3.msra.mxu0 %v2801_v20 }
 0x176   : > { %1938 = vmatprep.subr.mxu0 %v2514_v0 }
 0x177   : > { %1939 = vmatpush3.msra.mxu0 %v2805_v22 }
 0x178   : > { %1940 = vmatprep.subr.mxu0 %v2514_v0 }
 0x179   : > { %1941 = vmatpush3.msra.mxu0 %v2809_v24 }
 0x17a   : > { %1942 = vmatprep.subr.mxu0 %v2514_v0 }
 0x17b   : > { %1943 = vmatpush3.msra.mxu0 %v2813_v26 }
 0x17c   : > { %1944 = vmatprep.subr.mxu0 %v2514_v0 }
 0x17d   : > { %1945 = vmatpush3.msra.mxu0 %v2817_v28 }
 0x17e   : > { %1946 = vmatprep.subr.mxu0 %v2514_v0 }
 0x17f   : > { %1947 = vmatpush3.msra.mxu0 %v2823_v31  ;;  %v2958_v53 = vpop.f32.mrf.mxu0 }
 0x180   : > { %1948 = vmatprep.subr.mxu0 %v2514_v0  ;;  %v574_v45 = vadd.f32 %v2958_v53, %v2912_v44 }
 0x181   : > { %1949 = vmatpush3.msra.mxu0 %v2826_v33  ;;  %v2960_v54 = vpop.f32.mrf.mxu0 }
 0x182   : > { %1988 = vmatprep.subr.mxu0 %v2514_v0  ;;  %v569_v27 = vadd.f32 %v2912_v44, %v2960_v54 }
 0x222   : > { %v743_v56 = vpop.f32.mrf.mxu0 }
 0x223   : > { %v2963_v57 = vadd.f32 %v743_v56, %v544_v55 }
 0x224   : > { %v1882_v58 = vpop.f32.mrf.mxu0 }
 0x225   : > { %1916 = vmatmul.mubr.f32.vlgmr.msra.gmra.mxu1 %v2963_v57 }
 0x226   : > { %1954 = vmatpush3.msra.mxu1 %v2767_v3  ;;  %1985 = vmatprep.mubr.msk.f32.mxu1 %vm2515_vm0, %v2514_v0 }
 0x227   : > { %1955 = vmatprep.subr.mxu1 %v2514_v0 }
 0x228   : > { %1956 = vmatpush3.msra.mxu1 %v2770_v4 }
 0x229   : > { %1957 = vmatprep.subr.mxu1 %v2514_v0 }
 0x22a   : > { %1958 = vmatpush3.msra.mxu1 %v2773_v6 }
 0x22b   : > { %1959 = vmatprep.subr.mxu1 %v2514_v0 }
 0x22c   : > { %1960 = vmatpush3.msra.mxu1 %v2777_v8 }
 0x22d   : > { %1961 = vmatprep.subr.mxu1 %v2514_v0 }
 0x22e   : > { %1962 = vmatpush3.msra.mxu1 %v2781_v10 }
 0x22f   : > { %1963 = vmatprep.subr.mxu1 %v2514_v0 }
 0x230   : > { %1964 = vmatpush3.msra.mxu1 %v2785_v12 }
 0x231   : > { %1965 = vmatprep.subr.mxu1 %v2514_v0 }
 0x232   : > { %1966 = vmatpush3.msra.mxu1 %v2789_v14 }
 0x233   : > { %1967 = vmatprep.subr.mxu1 %v2514_v0 }
 0x234   : > { %1968 = vmatpush3.msra.mxu1 %v2793_v16 }
 0x235   : > { %1969 = vmatprep.subr.mxu1 %v2514_v0 }
 0x236   : > { %1970 = vmatpush3.msra.mxu1 %v2797_v18 }
 0x237   : > { %1971 = vmatprep.subr.mxu1 %v2514_v0 }
 0x238   : > { %1972 = vmatpush3.msra.mxu1 %v2801_v20 }
 0x239   : > { %1973 = vmatprep.subr.mxu1 %v2514_v0 }
 0x23a   : > { %1974 = vmatpush3.msra.mxu1 %v2805_v22 }
 0x23b   : > { %1975 = vmatprep.subr.mxu1 %v2514_v0 }
 0x23c   : > { %1976 = vmatpush3.msra.mxu1 %v2809_v24 }
 0x23d   : > { %1977 = vmatprep.subr.mxu1 %v2514_v0 }
 0x23e   : > { %1978 = vmatpush3.msra.mxu1 %v2813_v26 }
 0x23f   : > { %1979 = vmatprep.subr.mxu1 %v2514_v0 }
 0x240   : > { %1980 = vmatpush3.msra.mxu1 %v2817_v28 }
 0x241   : > { %1981 = vmatprep.subr.mxu1 %v2514_v0 }
 0x242   : > { %1982 = vmatpush3.msra.mxu1 %v2823_v31 }
 0x243   : > { %1983 = vmatprep.subr.mxu1 %v2514_v0 }
 0x244   : > { %1984 = vmatpush3.msra.mxu1 %v2826_v33 }
 0x245   : > { %2023 = vmatprep.subr.mxu1 %v2514_v0 }
 0x2e5   : > { %v818_v60 = vpop.f32.mrf.mxu1 }
 0x2e6   : > { %v3001_v61 = vadd.f32 %v818_v60, %v549_v59 }
 0x2e7   : > { %v1917_v62 = vpop.f32.mrf.mxu1 }
 0x2e8   : > { %1951 = vmatmul.mubr.f32.vlgmr.msra.gmra.mxu0 %v3001_v61 }
 0x2e9   : > { %1989 = vmatpush3.msra.mxu0 %v2767_v3  ;;  %2020 = vmatprep.mubr.msk.f32.mxu0 %vm2515_vm0, %v2514_v0 }
 0x2ea   : > { %1990 = vmatprep.subr.mxu0 %v2514_v0 }
 0x2eb   : > { %1991 = vmatpush3.msra.mxu0 %v2770_v4 }
 0x2ec   : > { %1992 = vmatprep.subr.mxu0 %v2514_v0 }
 0x2ed   : > { %1993 = vmatpush3.msra.mxu0 %v2773_v6 }
 0x2ee   : > { %1994 = vmatprep.subr.mxu0 %v2514_v0 }
 0x2ef   : > { %1995 = vmatpush3.msra.mxu0 %v2777_v8 }
 0x2f0   : > { %1996 = vmatprep.subr.mxu0 %v2514_v0 }
 0x2f1   : > { %1997 = vmatpush3.msra.mxu0 %v2781_v10 }
 0x2f2   : > { %1998 = vmatprep.subr.mxu0 %v2514_v0 }
 0x2f3   : > { %1999 = vmatpush3.msra.mxu0 %v2785_v12 }
 0x2f4   : > { %2000 = vmatprep.subr.mxu0 %v2514_v0 }
 0x2f5   : > { %2001 = vmatpush3.msra.mxu0 %v2789_v14 }
 0x2f6   : > { %2002 = vmatprep.subr.mxu0 %v2514_v0 }
 0x2f7   : > { %2003 = vmatpush3.msra.mxu0 %v2793_v16 }
 0x2f8   : > { %2004 = vmatprep.subr.mxu0 %v2514_v0 }
 0x2f9   : > { %2005 = vmatpush3.msra.mxu0 %v2797_v18 }
 0x2fa   : > { %2006 = vmatprep.subr.mxu0 %v2514_v0 }
 0x2fb   : > { %2007 = vmatpush3.msra.mxu0 %v2801_v20 }
 0x2fc   : > { %2008 = vmatprep.subr.mxu0 %v2514_v0 }
 0x2fd   : > { %2009 = vmatpush3.msra.mxu0 %v2805_v22 }
 0x2fe   : > { %2010 = vmatprep.subr.mxu0 %v2514_v0 }
 0x2ff   : > { %2011 = vmatpush3.msra.mxu0 %v2809_v24 }
 0x300   : > { %2012 = vmatprep.subr.mxu0 %v2514_v0 }
 0x301   : > { %2013 = vmatpush3.msra.mxu0 %v2813_v26 }
 0x302   : > { %2014 = vmatprep.subr.mxu0 %v2514_v0 }
 0x303   : > { %2015 = vmatpush3.msra.mxu0 %v2817_v28 }
 0x304   : > { %2016 = vmatprep.subr.mxu0 %v2514_v0 }
 0x305   : > { %2017 = vmatpush3.msra.mxu0 %v2823_v31 }
 0x306   : > { %2018 = vmatprep.subr.mxu0 %v2514_v0 }
 0x307   : > { %2019 = vmatpush3.msra.mxu0 %v2826_v33 }
 0x308   : > { %2058 = vmatprep.subr.mxu0 %v2514_v0 }
 0x3a8   : > { %v893_v1 = vpop.f32.mrf.mxu0 }
 0x3a9   : > { %v3040_v2 = vadd.f32 %v893_v1, %v554_v63 }
 0x3aa   : > { %v1952_v5 = vpop.f32.mrf.mxu0 }
 0x3ab   : > { %1986 = vmatmul.mubr.f32.vlgmr.msra.gmra.mxu1 %v3040_v2 }
 0x3ac   : > { %2024 = vmatpush3.msra.mxu1 %v2767_v3  ;;  %2055 = vmatprep.mubr.msk.f32.mxu1 %vm2515_vm0, %v2514_v0 }
 0x3ad   : > { %2025 = vmatprep.subr.mxu1 %v2514_v0 }
 0x3ae   : > { %2026 = vmatpush3.msra.mxu1 %v2770_v4 }
 0x3af   : > { %2027 = vmatprep.subr.mxu1 %v2514_v0 }
 0x3b0   : > { %2028 = vmatpush3.msra.mxu1 %v2773_v6 }
 0x3b1   : > { %2029 = vmatprep.subr.mxu1 %v2514_v0 }
 0x3b2   : > { %2030 = vmatpush3.msra.mxu1 %v2777_v8 }
 0x3b3   : > { %2031 = vmatprep.subr.mxu1 %v2514_v0 }
 0x3b4   : > { %2032 = vmatpush3.msra.mxu1 %v2781_v10 }
 0x3b5   : > { %2033 = vmatprep.subr.mxu1 %v2514_v0 }
 0x3b6   : > { %2034 = vmatpush3.msra.mxu1 %v2785_v12 }
 0x3b7   : > { %2035 = vmatprep.subr.mxu1 %v2514_v0 }
 0x3b8   : > { %2036 = vmatpush3.msra.mxu1 %v2789_v14 }
 0x3b9   : > { %2037 = vmatprep.subr.mxu1 %v2514_v0 }
 0x3ba   : > { %2038 = vmatpush3.msra.mxu1 %v2793_v16 }
 0x3bb   : > { %2039 = vmatprep.subr.mxu1 %v2514_v0 }
 0x3bc   : > { %2040 = vmatpush3.msra.mxu1 %v2797_v18 }
 0x3bd   : > { %2041 = vmatprep.subr.mxu1 %v2514_v0 }
 0x3be   : > { %2042 = vmatpush3.msra.mxu1 %v2801_v20 }
 0x3bf   : > { %2043 = vmatprep.subr.mxu1 %v2514_v0 }
 0x3c0   : > { %2044 = vmatpush3.msra.mxu1 %v2805_v22 }
 0x3c1   : > { %2045 = vmatprep.subr.mxu1 %v2514_v0 }
 0x3c2   : > { %2046 = vmatpush3.msra.mxu1 %v2809_v24 }
 0x3c3   : > { %2047 = vmatprep.subr.mxu1 %v2514_v0 }
 0x3c4   : > { %2048 = vmatpush3.msra.mxu1 %v2813_v26 }
 0x3c5   : > { %2049 = vmatprep.subr.mxu1 %v2514_v0 }
 0x3c6   : > { %2050 = vmatpush3.msra.mxu1 %v2817_v28 }
 0x3c7   : > { %2051 = vmatprep.subr.mxu1 %v2514_v0 }
 0x3c8   : > { %2052 = vmatpush3.msra.mxu1 %v2823_v31 }
 0x3c9   : > { %2053 = vmatprep.subr.mxu1 %v2514_v0 }
 0x3ca   : > { %2054 = vmatpush3.msra.mxu1 %v2826_v33 }
 0x46b   : > { %v968_v9 = vpop.f32.mrf.mxu1 }
 0x46c   : > { %v3078_v11 = vadd.f32 %v968_v9, %v559_v7 }
 0x46d   : > { %v1987_v13 = vpop.f32.mrf.mxu1 }
 0x46e   : > { %2021 = vmatmul.mubr.f32.vlgmr.msra.gmra.mxu0 %v3078_v11 }
 0x46f   : > { %2059 = vmatpush3.msra.mxu0 %v2767_v3  ;;  %2090 = vmatprep.mubr.msk.f32.mxu0 %vm2515_vm0, %v2514_v0  ;;  %v1224_v3 = vld [vmem:[#allocation12 + $0x78] sm:$0xff] }
 0x470   : > { %2060 = vmatprep.subr.mxu0 %v2514_v0  ;;  %2093 = vmatprep.subr.mxu1 %v1224_v3 }
 0x471   : > { %2061 = vmatpush3.msra.mxu0 %v2770_v4  ;;  %v564_v4 = vadd.f32 %v2954_v51, %v2912_v44 }
 0x472   : > { %2062 = vmatprep.subr.mxu0 %v2514_v0 }
 0x473   : > { %2063 = vmatpush3.msra.mxu0 %v2773_v6 }
 0x474   : > { %2064 = vmatprep.subr.mxu0 %v2514_v0 }
 0x475   : > { %2065 = vmatpush3.msra.mxu0 %v2777_v8 }
 0x476   : > { %2066 = vmatprep.subr.mxu0 %v2514_v0 }
 0x477   : > { %2067 = vmatpush3.msra.mxu0 %v2781_v10 }
 0x478   : > { %2068 = vmatprep.subr.mxu0 %v2514_v0 }
 0x479   : > { %2069 = vmatpush3.msra.mxu0 %v2785_v12  ;;  %v1223_v12 = vld [vmem:[#allocation12 + $0x70] sm:$0xff] }
 0x47a   : > { %2070 = vmatprep.subr.mxu0 %v2514_v0 }
 0x47b   : > { %2071 = vmatpush3.msra.mxu0 %v2789_v14  ;;  %v1222_v14 = vld [vmem:[#allocation12 + $0x68] sm:$0xff] }
 0x47c   : > { %2072 = vmatprep.subr.mxu0 %v2514_v0 }
 0x47d   : > { %2073 = vmatpush3.msra.mxu0 %v2793_v16  ;;  %v1219_v16 = vld [vmem:[#allocation12 + $0x50] sm:$0xff] }
 0x47e   : > { %2074 = vmatprep.subr.mxu0 %v2514_v0 }
 0x47f   : > { %2075 = vmatpush3.msra.mxu0 %v2797_v18  ;;  %v1217_v18 = vld [vmem:[#allocation12 + $0x40] sm:$0xff] }
 0x480   : > { %2076 = vmatprep.subr.mxu0 %v2514_v0 }
 0x481   : > { %2077 = vmatpush3.msra.mxu0 %v2801_v20  ;;  %v1215_v20 = vld [vmem:[#allocation12 + $0x30] sm:$0xff] }
 0x482   : > { %2078 = vmatprep.subr.mxu0 %v2514_v0 }
 0x483   : > { %2079 = vmatpush3.msra.mxu0 %v2805_v22  ;;  %v1213_v22 = vld [vmem:[#allocation12 + $0x20] sm:$0xff] }
 0x484   : > { %2080 = vmatprep.subr.mxu0 %v2514_v0 }
 0x485   : > { %2081 = vmatpush3.msra.mxu0 %v2809_v24  ;;  %v1211_v24 = vld [vmem:[#allocation12 + $0x10] sm:$0xff] }
 0x486   : > { %2082 = vmatprep.subr.mxu0 %v2514_v0 }
 0x487   : > { %2083 = vmatpush3.msra.mxu0 %v2813_v26  ;;  %v1209_v26 = vld [vmem:[#allocation12] sm:$0xff] }
 0x488   : > { %2084 = vmatprep.subr.mxu0 %v2514_v0 }
 0x489   : > { %2085 = vmatpush3.msra.mxu0 %v2817_v28 }
 0x48a   : > { %2086 = vmatprep.subr.mxu0 %v2514_v0 }
 0x48b   : > { %2087 = vmatpush3.msra.mxu0 %v2823_v31  ;;  %v3126_v31 = vld [vmem:[%s3233_s6] ss:$0 sm:$0xff] }
 0x48c   : > { %2088 = vmatprep.subr.mxu0 %v2514_v0  ;;  %v1220_v0 = vld [vmem:[#allocation12 + $0x58] sm:$0xff] }
 0x48d   : > { %2089 = vmatpush3.msra.mxu0 %v2826_v33 }
 0x52e   : > { %v1043_v6 = vpop.f32.mrf.mxu0 }
 0x52f   : > { %v1047_v8 = vadd.f32 %v1043_v6, %v564_v4 }
 0x530   : > { %v2022_v10 = vpop.f32.mrf.mxu0 }
 0x531   : > { %2056 = vmatmul.mubr.f32.vlgmr.msra.gmra.mxu1 %v1047_v8 }
 0x532   : > { %2094 = vmatpush3.msra.mxu1 %v1224_v3  ;;  %2125 = vmatprep.mubr.f32.mxu1 %v2915_v48 }
 0x533   : > { %2095 = vmatprep.subr.mxu1 %v1223_v12 }
 0x534   : > { %2096 = vmatpush3.msra.mxu1 %v1223_v12 }
 0x535   : > { %2097 = vmatprep.subr.mxu1 %v1222_v14 }
 0x536   : > { %2098 = vmatpush3.msra.mxu1 %v1222_v14 }
 0x537   : > { %2099 = vmatprep.subr.mxu1 %v1221_v15 }
 0x538   : > { %2100 = vmatpush3.msra.mxu1 %v1221_v15 }
 0x539   : > { %2101 = vmatprep.subr.mxu1 %v1220_v0 }
 0x53a   : > { %2102 = vmatpush3.msra.mxu1 %v1220_v0 }
 0x53b   : > { %2103 = vmatprep.subr.mxu1 %v1219_v16 }
 0x53c   : > { %2104 = vmatpush3.msra.mxu1 %v1219_v16 }
 0x53d   : > { %2105 = vmatprep.subr.mxu1 %v1218_v17 }
 0x53e   : > { %2106 = vmatpush3.msra.mxu1 %v1218_v17 }
 0x53f   : > { %2107 = vmatprep.subr.mxu1 %v1217_v18 }
 0x540   : > { %2108 = vmatpush3.msra.mxu1 %v1217_v18 }
 0x541   : > { %2109 = vmatprep.subr.mxu1 %v1216_v19 }
 0x542   : > { %2110 = vmatpush3.msra.mxu1 %v1216_v19 }
 0x543   : > { %2111 = vmatprep.subr.mxu1 %v1215_v20 }
 0x544   : > { %2112 = vmatpush3.msra.mxu1 %v1215_v20 }
 0x545   : > { %2113 = vmatprep.subr.mxu1 %v1214_v21 }
 0x546   : > { %2114 = vmatpush3.msra.mxu1 %v1214_v21 }
 0x547   : > { %2115 = vmatprep.subr.mxu1 %v1213_v22 }
 0x548   : > { %2116 = vmatpush3.msra.mxu1 %v1213_v22 }
 0x549   : > { %2117 = vmatprep.subr.mxu1 %v1212_v23 }
 0x54a   : > { %2118 = vmatpush3.msra.mxu1 %v1212_v23 }
 0x54b   : > { %2119 = vmatprep.subr.mxu1 %v1211_v24 }
 0x54c   : > { %2120 = vmatpush3.msra.mxu1 %v1211_v24 }
 0x54d   : > { %2121 = vmatprep.subr.mxu1 %v1210_v25 }
 0x54e   : > { %2122 = vmatpush3.msra.mxu1 %v1210_v25 }
 0x54f   : > { %2123 = vmatprep.subr.mxu1 %v1209_v26 }
 0x550   : > { %2124 = vmatpush3.msra.mxu1 %v1209_v26 }
 0x551   : > { %2126 = vmatmul.mubr.f32.vlgmr.msra.gmra.mxu1 %v2963_v57 }
 0x552   : > { %2128 = vmatprep.mubr.f32.mxu1 %v3001_v61 }
 0x555   : > { %2129 = vmatmul.mubr.f32.gmra.mxu1 %v3040_v2 }
 0x556   : > { %2131 = vmatprep.mubr.f32.mxu1 %v3078_v11 }
 0x559   : > { %2132 = vmatmul.mubr.f32.gmra.mxu1 %v1047_v8 }
 0x5f1   : > { %v1118_v28 = vpop.f32.mrf.mxu1 }
 0x5f2   : > { %v1122_v29 = vadd.f32 %v1118_v28, %v569_v27 }
 0x5f3   : > { %v2057_v30 = vpop.f32.mrf.mxu1 }
 0x5f4   : > { %2091 = vmatmul.mubr.f32.vlgmr.msra.gmra.mxu0 %v1122_v29  ;;  %2134 = vmatprep.mubr.f32.mxu1 %v1122_v29 }
 0x611   : > { %v2127_v32 = vpop.f32.mrf.mxu1 }
 0x612   : > { %v1304_v33 = vadd.f32 %v2127_v32, %v3126_v31 }
 0x613   : > { %v1298_v34 = vpop.f32.mrf.mxu1 }
 0x614   : > { %1338 = vst [vmem:[%s3131_s22 + $0x8] sm:$0xff] %v1304_v33  ;;  %v1299_v35 = vadd.f32 %v3126_v31, %v1298_v34 }
 0x615   : > { %v2130_v36 = vpop.f32.mrf.mxu1 }
 0x616   : > { %1337 = vst [vmem:[%s3131_s22] sm:$0xff] %v1299_v35  ;;  %v1314_v37 = vadd.f32 %v2130_v36, %v3126_v31 }
 0x617   : > { %v1308_v38 = vpop.f32.mrf.mxu1 }
 0x618   : > { %1340 = vst [vmem:[%s3131_s22 + $0x18] sm:$0xff] %v1314_v37  ;;  %v1309_v39 = vadd.f32 %v3126_v31, %v1308_v38 }
 0x619   : > { %v2133_v40 = vpop.f32.mrf.mxu1 }
 0x61a   : > { %1339 = vst [vmem:[%s3131_s22 + $0x10] sm:$0xff] %v1309_v39  ;;  %v1324_v41 = vadd.f32 %v2133_v40, %v3126_v31 }
 0x61b   : > { %v1318_v42 = vpop.f32.mrf.mxu1 }
 0x61c   : > { %1342 = vst [vmem:[%s3131_s22 + $0x28] sm:$0xff] %v1324_v41  ;;  %v1319_v43 = vadd.f32 %v3126_v31, %v1318_v42 }
 0x61e   : > { %1341 = vst [vmem:[%s3131_s22 + $0x20] sm:$0xff] %v1319_v43 }
 0x6b4   : > { %v1193_v46 = vpop.f32.mrf.mxu0 }
 0x6b5   : > { %v1197_v47 = vadd.f32 %v1193_v46, %v574_v45 }
 0x6b6   : > { %v2092_v48 = vpop.f32.mrf.mxu0 }
 0x6b7   : > { %1348 = vst [vmem:[%s432_s19] sm:$0xff] %v1197_v47  ;;  %2135 = vmatmul.mubr.f32.gmra.mxu1 %v1197_v47 }
 0x6b8   : > { %2395 = shalt.err (!%p2392_p11)
}
 0x6b9   : > { %s2396_s27 = scalar_lea.hbm %s1384_s2, 128  ;;  %s2400_s11 = scalar_lea.hbm %s3282_s21, 256 }
 0x6ba   : > { %p2397_p13 = scmp.ne.s32.totalorder %s1384_s2, %s2396_s27  ;;  %p2401_p2 = scmp.lt.s32.totalorder %s1384_s2, %s3282_s21 }
 0x6bb   : > { %p2402_p1 = scmp.lt.s32.totalorder %s2400_s11, %s2396_s27 }
 0x6bc   : > { %p2398_p5 = pnand %p2397_p13, %p3283_p8 }
 0x6bd   : > { %p2403_p3 = por %p2402_p1, %p2401_p2 }
 0x6be   : > { %p2399_p12 = pneg %p2398_p5 }
 0x6c0   : > { %p2404_p7 = pnand %p2403_p3, %p2399_p12 }
 0x6c2   : > { %2407 = shalt.err (!%p2404_p7)
}
 0x6c3   : > { %2154 = dma.vmem_to_hbm [thread:$0]  (%p3283_p8), %s1387_s26, 128, %s1384_s2, %s1355_s12  }
 0x6c4   : > { %s1370_s23 = sshll.u32 %s3131_s22, 4  ;;  %s3284_s3 = sld [smem:[#allocation31_spill]]  ;;  %s3176_s23 = int_to_ptr.vmem [resolvable:$true] %s1370_s23 }
 0x6c5   : > { %s1350_s2 = scalar_lea.sflag [#allocation6], %s2734_s0  ;;  %s2408_s26 = scalar_lea.vmem %s3176_s23, 1024 }
 0x6c6   : > { %p2409_p9 = scmp.ne.s32.totalorder %s3176_s23, %s2408_s26  ;;  %s2517_s25 = smov [#allocation13]  }
 0x6c7   : > { %s2412_s12 = sshll.u32 %s2517_s25, 4  ;;  %s2413_s12 = int_to_ptr.vmem [resolvable:$false] %s2412_s12 }
 0x6c8   : > { %p2410_p0 = pnand %p2409_p9, %p3283_p8  ;;  %p2415_p10 = scmp.lt.s32.totalorder %s3176_s23, %s2413_s12 }
 0x6ca   : > { %s3174_s4 = scalar_lea.hbm %s3284_s3, %s1581_s13  ;;  %p2411_p6 = pneg %p2410_p0 }
 0x6cb   : > { %s2414_s13 = scalar_lea.vmem %s2413_s12, 2048 }
 0x6cc   : > { %p2416_p4 = scmp.lt.s32.totalorder %s2414_s13, %s2408_s26 }
 0x6ce   : > { %p2417_p11 = por %p2416_p4, %p2415_p10 }
 0x6d0   : > { %p2418_p13 = pnand %p2417_p11, %p2411_p6 }
 0x777   : > { %v2136_v44 = vpop.f32.mrf.mxu1 }
 0x778   : > { %v1334_v49 = vadd.f32 %v2136_v44, %v3126_v31 }
 0x779   : > { %v1328_v50 = vpop.f32.mrf.mxu1 }
 0x77a   : > { %1344 = vst [vmem:[%s3131_s22 + $0x38] sm:$0xff] %v1334_v49  ;;  %v1329_v51 = vadd.f32 %v3126_v31, %v1328_v50 }
 0x77c   : > { %1343 = vst [vmem:[%s3131_s22 + $0x30] sm:$0xff] %v1329_v51 }
 0x77d   : > { %2421 = shalt.err (!%p2418_p13)
}
 0x77e   : > { %s2422_s22 = scalar_lea.hbm %s3174_s4, 1024  ;;  %s2426_s8 = scalar_lea.hbm %s3284_s3, 2048 }
 0x77f   : > { %p2423_p5 = scmp.ne.s32.totalorder %s3174_s4, %s2422_s22  ;;  %p2427_p1 = scmp.lt.s32.totalorder %s3174_s4, %s3284_s3 }
 0x780   : > { %p2428_p3 = scmp.lt.s32.totalorder %s2426_s8, %s2422_s22 }
 0x781   : > { %p2424_p12 = pnand %p2423_p5, %p3283_p8 }
 0x782   : > { %p2429_p7 = por %p2428_p3, %p2427_p1 }
 0x783   : > { %p2425_p2 = pneg %p2424_p12 }
 0x785   : > { %p2430_p9 = pnand %p2429_p7, %p2425_p2 }
 0x787   : > { %2433 = shalt.err (!%p2430_p9)
}
 0x788   : > { %s2518_s18 = smov 128   ;;  %s2519_s11 = smov 256  }
 0x789   : > { %s2520_s15 = smov 8  }
 0x78a   : > { %2153 = dma.vmem_to_hbm [thread:$0]  (%p3283_p8), %s3176_s23, 1024, %s3174_s4, %s1350_s2, %s2518_s18, %s2519_s11, %s2520_s15  }
 0x78b PF: > { %s3285_s24 = sld [smem:[#allocation22_spill]]  ;;  %p3288_p6 = scmp.ge.s32.totalorder %s2504_s10, 2 }
 0x78c   : > { %s3286_s19 = sld [smem:[#allocation25_spill]] }
 0x791   : > { %s1398_s20 = sand.u32 1, %s3285_s24  }
 0x792   : > { %p3287_p0 = scmp.ne.s32.totalorder %s3286_s19, 0  ;;  %s1399_s26 = scalar_lea.sflag [#allocation6], %s1398_s20 }
 0x794   : > { %p2175_p10 = pnand %p3288_p6, %p3287_p0 }
 0x796   : > { %p2176_p4 = pneg %p2175_p10 }
 0x798   : > { %2475 = dma.done.wait (%p2176_p4), %s1399_s26, 1024  }
 0x799   : > { %2477 = vsyncadd (%p2176_p4), %s1399_s26, 4294966272  ;;  %s1408_s25 = scalar_lea.sflag [#allocation15], %s1398_s20 }
 0x79a   : > { %2479 = dma.done.wait (%p2176_p4), %s1408_s25, 128  }
 0x79b   : > { %2481 = vsyncadd (%p2176_p4), %s1408_s25, 4294967168  ;;  %s32_s10 = sadd.s32 1, %s2504_s10   ;;  %s3289_s0 = sld [smem:[#allocation26_spill]] }
 0x79c   : > { %p29_p11 = scmp.ge.s32.totalorder %s32_s10, 4   ;;  %s3290_s27 = smov %s2488_s28 }
 0x79d   : > { %s3291_s28 = smov %s2492_s29  ;;  %s3292_s29 = smov %s2717_s14 }
 0x79e   : > { %s3293_s30 = smov %s2500_s9  ;;  %31 = sbr.rel (!%p29_p11) target bundleno = 18 (0x12), region = 157 }
 0x7a1   : > { %s3294_s9 = smov %s3289_s0 }
 0x7a3   :  { %1413 = vsyncpa [#allocation5], 1 }
 0x7a4   :  { %1415 = vsyncpa [#allocation5 + $0x1], 1 }
 0x7a5   :  { %1416 = vsyncpa [#allocation8], 1 }
 0x7a6   :  { %1418 = vsyncpa [#allocation8 + $0x1], 1 }
 0x7a7   :  { %1419 = vsyncpa [#allocation11], 1 }
 0x7a8   :  { %1420 = vsyncpa [#allocation6], 1 }
 0x7a9   :  { %1422 = vsyncpa [#allocation6 + $0x1], 1 }
 0x7aa   :  { %1423 = vsyncpa [#allocation15], 1 }
 0x7ab   :  { %1425 = vsyncpa [#allocation15 + $0x1], 1 }

</bundles_post_ra>
